<compile_context>
chip_gen: v6e
topology: v6e:2x2x1
jax: 0.10.0
libtpu: 0.0.40
codegen_flags: <defaults>
</compile_context>

<pallas_src>
import functools

import jax
import jax.numpy as jnp
from jax.experimental import pallas as pl
from jax.experimental.pallas import tpu as pltpu

CP = 128                     # channel dims padded to one 128-lane vreg
CIN_PAD = 8                  # raw 1-channel input padded to 8 lanes only
NUM_CLASSES = 5
VMEM_LIMIT = 32 * 1024 * 1024
HALO = 8                     # front halo rows -> bulk data store at row 8 (aligned)

# Static per-block config for num_block=(2, 2):
#   (stride, w1_idx, w2_idx, bn1_row, bn2_row, shortcut_idx, bn_sc_row)
BLOCK_CFGS = (
    (2, 0, 1, 1, 2, 0, 3),        # 32 -> 64, stride 2, 1x1 shortcut
    (1, 2, 3, 4, 5, None, None),  # 64 -> 64
    (2, 4, 5, 6, 7, 1, 8),        # 64 -> 128, stride 2, 1x1 shortcut
    (1, 6, 7, 9, 10, None, None), # 128 -> 128
)
BN_STEM = 0
BN_FC_BIAS = 11
N_BN_ROWS = 12


# ---------------------------------------------------------------------------
# Fused whole-network kernel (one batch sample per grid step)
# ---------------------------------------------------------------------------
def rsnet_kernel(x_ref, stem_w_ref, conv_w_ref, sc_w_ref, fc_w_ref,
                 scale_ref, shift_ref, o_ref,
                 a0, b0, h0, b1, h1, *, L):
    f32, bf16 = jnp.float32, jnp.bfloat16

    def bn_s(i):
        return scale_ref[pl.ds(i, 1), :]            # (1, CP)

    def bn_b(i):
        return shift_ref[pl.ds(i, 1), :]            # (1, CP)

    def fill(buf, data, l):
        """Store data (l, C) at rows [8, 8+l); zero only the 2 halo rows a conv reads."""
        zrow = jnp.zeros((1, buf.shape[-1]), f32)
        buf[pl.ds(HALO - 1, 1), :] = zrow           # row 7  (left halo)
        buf[pl.ds(HALO, l), :] = data               # rows 8..8+l-1 (aligned bulk store)
        buf[pl.ds(HALO + l, 1), :] = zrow           # row 8+l (right halo)

    def conv3(buf, tap_w, l_out, stride):
        """k=3 / pad=1 conv as 3 shifted (optionally strided) bf16 MXU matmuls."""
        acc = jnp.zeros((l_out, CP), f32)
        for t in range(3):                          # static 3-tap unroll
            if stride == 1:
                lhs = buf[pl.ds(HALO - 1 + t, l_out), :]
            else:
                lhs = buf[pl.ds(HALO - 1 + t, l_out, stride=stride), :]
            acc = acc + jnp.dot(lhs.astype(bf16), tap_w(t),
                                preferred_element_type=f32)
        return acc

    # --- stem: Conv1d(1->32, k=3, pad=1, s=1) + BN + ReLU on the VPU (Cin==1) ---
    xc = x_ref[0][:, 0:1]                                        # (L, 1) f32
    z1 = jnp.zeros((1, 1), f32)
    x_prev = jnp.concatenate([z1, xc[:L - 1, :]], axis=0)        # x[i-1]
    x_next = jnp.concatenate([xc[1:, :], z1], axis=0)            # x[i+1]
    acc = (x_prev * stem_w_ref[pl.ds(0, 1), :]
           + xc * stem_w_ref[pl.ds(1, 1), :]
           + x_next * stem_w_ref[pl.ds(2, 1), :])                # (L, CP)
    fill(a0, jnp.maximum(acc * bn_s(BN_STEM) + bn_b(BN_STEM), 0.0), L)

    # --- residual BasicBlocks (statically unrolled) ----------------------------
    def basic_block(x_buf, h_buf, l_in, stride, w1, w2, bn1, bn2, sc, bnsc):
        l_out = (l_in - 1) // stride + 1
        # conv1 (k=3, stride via strided tap reads) + BN + ReLU
        h = jnp.maximum(
            conv3(x_buf, lambda t: conv_w_ref[w1, t, :, :], l_out, stride)
            * bn_s(bn1) + bn_b(bn1), 0.0)
        fill(h_buf, h, l_out)
        # shortcut: identity, or strided 1x1 conv + BN
        if sc is None:
            res = x_buf[pl.ds(HALO, l_out), :]
        else:
            if stride == 1:
                xs = x_buf[pl.ds(HALO, l_out), :]
            else:
                xs = x_buf[pl.ds(HALO, l_out, stride=stride), :]
            res = (jnp.dot(xs.astype(bf16), sc_w_ref[sc, :, :],
                           preferred_element_type=f32)
                   * bn_s(bnsc) + bn_b(bnsc))
        # conv2 (k=3, stride 1) + BN + residual add + ReLU
        acc2 = conv3(h_buf, lambda t: conv_w_ref[w2, t, :, :], l_out, 1)
        return jnp.maximum(acc2 * bn_s(bn2) + bn_b(bn2) + res, 0.0), l_out

    # (input buffer, intermediate buffer, output buffer) per block.
    bufs = ((a0, h0, b0), (b0, h0, b0), (b0, h1, b1), (b1, h1, None))
    l = L
    y = None
    for (x_buf, h_buf, o_buf), (stride, w1, w2, bn1, bn2, sc, bnsc) in zip(bufs, BLOCK_CFGS):
        y, l = basic_block(x_buf, h_buf, l, stride, w1, w2, bn1, bn2, sc, bnsc)
        if o_buf is not None:
            fill(o_buf, y, l)

    # --- AdaptiveAvgPool1d(1) + Linear fused head ------------------------------
    pooled = jnp.mean(y, axis=0, keepdims=True)                  # (1, CP)
    logits = jnp.dot(pooled.astype(bf16), fc_w_ref[...],
                     preferred_element_type=f32) + bn_b(BN_FC_BIAS)
    o_ref[0] = logits                                            # (1, CP)


# ---------------------------------------------------------------------------
# pallas_call wrapper
# ---------------------------------------------------------------------------
def _rsnet_pallas(params, x_pad):
    n, L, _ = x_pad.shape
    l1 = (L - 1) // 2 + 1          # length after layer1 (stride-2 block)
    l2 = (l1 - 1) // 2 + 1         # length after layer2 (stride-2 block)

    def full(nd):
        return lambda i: (0,) * nd

    return pl.pallas_call(
        functools.partial(rsnet_kernel, L=L),
        out_shape=jax.ShapeDtypeStruct((n, 1, CP), jnp.float32),
        grid=(n,),
        in_specs=[
            pl.BlockSpec((1, L, CIN_PAD), lambda i: (i, 0, 0)),   # x (per sample)
            pl.BlockSpec((3, CP), full(2)),                       # stem conv taps (f32)
            pl.BlockSpec((8, 3, CP, CP), full(4)),                # k=3 conv weights (bf16)
            pl.BlockSpec((2, CP, CP), full(3)),                   # 1x1 shortcut weights (bf16)
            pl.BlockSpec((CP, CP), full(2)),                      # fc weight (bf16)
            pl.BlockSpec((N_BN_ROWS, CP), full(2)),               # folded BN scales (f32)
            pl.BlockSpec((N_BN_ROWS, CP), full(2)),               # folded BN shifts + fc bias
        ],
        out_specs=pl.BlockSpec((1, 1, CP), lambda i: (i, 0, 0)),
        scratch_shapes=[
            pltpu.VMEM((L + 2 * HALO, CP), jnp.float32),    # a0: stem out / block0 in
            pltpu.VMEM((l1 + 2 * HALO, CP), jnp.float32),   # b0: block0/1 out, block1/2 in
            pltpu.VMEM((l1 + 2 * HALO, CP), jnp.float32),   # h0: block0/1 intermediate
            pltpu.VMEM((l2 + 2 * HALO, CP), jnp.float32),   # b1: block2 out / block3 in
            pltpu.VMEM((l2 + 2 * HALO, CP), jnp.float32),   # h1: block2/3 intermediate
        ],
        compiler_params=pltpu.CompilerParams(
            dimension_semantics=("parallel",),
            vmem_limit_bytes=VMEM_LIMIT),
    )(x_pad, params["stem_w"], params["conv_w"], params["sc_w"],
      params["fc_w"], params["scales"], params["shifts"])


@jax.jit
def rsnet_forward(params, x_ncl):
    # x_ncl: (N, 1, L) PyTorch Conv1d layout -> channels-last, padded to 8 lanes.
    x = jnp.transpose(x_ncl, (0, 2, 1)).astype(jnp.float32)         # (N, L, 1)
    x = jnp.pad(x, ((0, 0), (0, 0), (0, CIN_PAD - x.shape[-1])))    # (N, L, 8)
    out = _rsnet_pallas(params, x)                                  # (N, 1, CP)
    return out[:, 0, :NUM_CLASSES]                                  # (N, classes)


# ---------------------------------------------------------------------------
# Deterministic parameter init (PyTorch layouts) packed into kernel layout
# ---------------------------------------------------------------------------
def _init_bn(key, c, eps=1e-5):
    k1, k2, k3, k4 = jax.random.split(key, 4)
    gamma = 1.0 + 0.1 * jax.random.normal(k1, (c,), jnp.float32)
    beta = 0.1 * jax.random.normal(k2, (c,), jnp.float32)
    mean = 0.1 * jax.random.normal(k3, (c,), jnp.float32)
    var = 0.5 + jax.random.uniform(k4, (c,), jnp.float32)
    scale = gamma / jnp.sqrt(var + eps)
    shift = beta - mean * scale
    return scale, shift


def _pad_row(v):
    return jnp.pad(v, (0, CP - v.shape[0])).astype(jnp.float32)


def _prep_conv_w(w):
    """(Cout, Cin, K) f32 -> (K, CP, CP) bf16, zero-padded channels."""
    cout, cin, k = w.shape
    wt = jnp.transpose(w, (2, 1, 0))                      # (K, Cin, Cout)
    wt = jnp.pad(wt, ((0, 0), (0, CP - cin), (0, CP - cout)))
    return wt.astype(jnp.bfloat16)


def init_params(key, num_classes=NUM_CLASSES):
    keys = iter(jax.random.split(key, 32))

    # Stem: Conv1d(1, 32, k=3, bias=False) + BatchNorm1d(32)
    w = 0.3 * jax.random.normal(next(keys), (32, 1, 3), jnp.float32)
    s, b = _init_bn(next(keys), 32)
    stem_w = jnp.zeros((3, CP), jnp.float32).at[:, :32].set(w[:, 0, :].T)
    scales, shifts = [_pad_row(s)], [_pad_row(b)]         # row 0 = stem BN

    conv_ws, sc_ws = [], []
    in_ch = 32
    for out_ch, stride in ((64, 2), (64, 1), (128, 2), (128, 1)):
        w1 = 0.1 * jax.random.normal(next(keys), (out_ch, in_ch, 3), jnp.float32)
        s1, b1 = _init_bn(next(keys), out_ch)
        w2 = 0.1 * jax.random.normal(next(keys), (out_ch, out_ch, 3), jnp.float32)
        s2, b2 = _init_bn(next(keys), out_ch)
        conv_ws += [_prep_conv_w(w1), _prep_conv_w(w2)]
        scales += [_pad_row(s1), _pad_row(s2)]
        shifts += [_pad_row(b1), _pad_row(b2)]
        if stride != 1 or in_ch != out_ch:                # 1x1 conv shortcut + BN
            ws = 0.1 * jax.random.normal(next(keys), (out_ch, in_ch, 1), jnp.float32)
            ss, bs = _init_bn(next(keys), out_ch)
            sc_ws.append(_prep_conv_w(ws)[0])             # (CP, CP) bf16
            scales.append(_pad_row(ss))
            shifts.append(_pad_row(bs))
        in_ch = out_ch

    fc_w = 0.1 * jax.random.normal(next(keys), (num_classes, 128), jnp.float32)
    fc_b = 0.1 * jax.random.normal(next(keys), (num_classes,), jnp.float32)
    scales.append(jnp.ones((CP,), jnp.float32))           # row 11 unused (fc has no scale)
    shifts.append(_pad_row(fc_b))                         # row 11 = fc bias

    return {
        "stem_w": stem_w,                                 # (3, CP) f32
        "conv_w": jnp.stack(conv_ws),                     # (8, 3, CP, CP) bf16
        "sc_w": jnp.stack(sc_ws),                         # (2, CP, CP) bf16
        "fc_w": jnp.pad(fc_w.T, ((0, CP - 128),
                                 (0, CP - num_classes))).astype(jnp.bfloat16),
        "scales": jnp.stack(scales),                      # (12, CP) f32
        "shifts": jnp.stack(shifts),                      # (12, CP) f32
    }


# ---------------------------------------------------------------------------
if __name__ == "__main__":
    key = jax.random.PRNGKey(0)
    kp, kx = jax.random.split(key)
    params = init_params(kp, num_classes=NUM_CLASSES)

    # Conv1d(1, 32, ...) => input is (N, C=1, L).  Small shape: N=2, L=16.
    x = jax.random.normal(kx, (2, 1, 16), jnp.float32)

    out = rsnet_forward(params, x)
    out = jax.block_until_ready(out)
    assert out.shape == (2, NUM_CLASSES), out.shape
    print("KERNEL_OK")
</pallas_src>

<mosaic_0001>
module attributes {stable_mosaic.version = 11 : i64} {
  func.func @rsnet_kernel(%arg0: i32, %arg1: memref<1x16x8xf32, #tpu.memory_space<vmem>>, %arg2: memref<3x128xf32, #tpu.memory_space<vmem>>, %arg3: memref<8x3x128x128xbf16, #tpu.memory_space<vmem>>, %arg4: memref<2x128x128xbf16, #tpu.memory_space<vmem>>, %arg5: memref<128x128xbf16, #tpu.memory_space<vmem>>, %arg6: memref<12x128xf32, #tpu.memory_space<vmem>>, %arg7: memref<12x128xf32, #tpu.memory_space<vmem>>, %arg8: memref<1x1x128xf32, #tpu.memory_space<vmem>>, %arg9: memref<32x128xf32, #tpu.memory_space<vmem>>, %arg10: memref<24x128xf32, #tpu.memory_space<vmem>>, %arg11: memref<24x128xf32, #tpu.memory_space<vmem>>, %arg12: memref<20x128xf32, #tpu.memory_space<vmem>>, %arg13: memref<20x128xf32, #tpu.memory_space<vmem>>) attributes {dimension_semantics = [#tpu.dimension_semantics<parallel>], iteration_bounds = array<i64: 2>, scalar_prefetch = 0 : i64, scratch_operands = 5 : i64, tpu.core_type = #tpu.core_type<tc>, window_params = [{transform_indices = @transform_0, window_bounds = array<i64: 1, 16, 8>}, {pipeline_mode = #tpu.pipeline_mode<synchronous>, transform_indices = @transform_1, window_bounds = array<i64: 3, 128>}, {pipeline_mode = #tpu.pipeline_mode<synchronous>, transform_indices = @transform_2, window_bounds = array<i64: 8, 3, 128, 128>}, {pipeline_mode = #tpu.pipeline_mode<synchronous>, transform_indices = @transform_3, window_bounds = array<i64: 2, 128, 128>}, {pipeline_mode = #tpu.pipeline_mode<synchronous>, transform_indices = @transform_4, window_bounds = array<i64: 128, 128>}, {pipeline_mode = #tpu.pipeline_mode<synchronous>, transform_indices = @transform_5, window_bounds = array<i64: 12, 128>}, {pipeline_mode = #tpu.pipeline_mode<synchronous>, transform_indices = @transform_6, window_bounds = array<i64: 12, 128>}, {transform_indices = @transform_7, window_bounds = array<i64: 1, 1, 128>}]} {
    %c0 = arith.constant 0 : index
    %c0_0 = arith.constant 0 : index
    %c0_1 = arith.constant 0 : index
    %0 = vector.load %arg1[%c0, %c0_0, %c0_1] : memref<1x16x8xf32, #tpu.memory_space<vmem>>, vector<1x16x8xf32>
    %1 = vector.shape_cast %0 : vector<1x16x8xf32> to vector<16x8xf32>
    %2 = vector.extract_strided_slice %1 {offsets = [0, 0], sizes = [16, 1], strides = [1, 1]} : vector<16x8xf32> to vector<16x1xf32>
    %cst = arith.constant 0.000000e+00 : f32
    %3 = vector.broadcast %cst : f32 to vector<1x1xf32>
    %4 = vector.extract_strided_slice %2 {offsets = [0, 0], sizes = [15, 1], strides = [1, 1]} : vector<16x1xf32> to vector<15x1xf32>
    %5 = tpu.concatenate %3, %4 in 0 : vector<1x1xf32>, vector<15x1xf32> -> vector<16x1xf32>
    %6 = vector.extract_strided_slice %2 {offsets = [1, 0], sizes = [15, 1], strides = [1, 1]} : vector<16x1xf32> to vector<15x1xf32>
    %7 = tpu.concatenate %6, %3 in 0 : vector<15x1xf32>, vector<1x1xf32> -> vector<16x1xf32>
    %c0_2 = arith.constant 0 : index
    %c0_3 = arith.constant 0 : index
    %8 = vector.load %arg2[%c0_2, %c0_3] : memref<3x128xf32, #tpu.memory_space<vmem>>, vector<1x128xf32>
    %9 = vector.broadcast %5 : vector<16x1xf32> to vector<16x128xf32>
    %10 = vector.broadcast %8 : vector<1x128xf32> to vector<16x128xf32>
    %11 = arith.mulf %9, %10 : vector<16x128xf32>
    %c1 = arith.constant 1 : index
    %c0_4 = arith.constant 0 : index
    %12 = vector.load %arg2[%c1, %c0_4] : memref<3x128xf32, #tpu.memory_space<vmem>>, vector<1x128xf32>
    %13 = vector.broadcast %2 : vector<16x1xf32> to vector<16x128xf32>
    %14 = vector.broadcast %12 : vector<1x128xf32> to vector<16x128xf32>
    %15 = arith.mulf %13, %14 : vector<16x128xf32>
    %16 = arith.addf %11, %15 : vector<16x128xf32>
    %c2 = arith.constant 2 : index
    %c0_5 = arith.constant 0 : index
    %17 = vector.load %arg2[%c2, %c0_5] : memref<3x128xf32, #tpu.memory_space<vmem>>, vector<1x128xf32>
    %18 = vector.broadcast %7 : vector<16x1xf32> to vector<16x128xf32>
    %19 = vector.broadcast %17 : vector<1x128xf32> to vector<16x128xf32>
    %20 = arith.mulf %18, %19 : vector<16x128xf32>
    %21 = arith.addf %16, %20 : vector<16x128xf32>
    %c0_6 = arith.constant 0 : index
    %c0_7 = arith.constant 0 : index
    %22 = vector.load %arg6[%c0_6, %c0_7] : memref<12x128xf32, #tpu.memory_space<vmem>>, vector<1x128xf32>
    %23 = vector.broadcast %22 : vector<1x128xf32> to vector<16x128xf32>
    %24 = arith.mulf %21, %23 : vector<16x128xf32>
    %c0_8 = arith.constant 0 : index
    %c0_9 = arith.constant 0 : index
    %25 = vector.load %arg7[%c0_8, %c0_9] : memref<12x128xf32, #tpu.memory_space<vmem>>, vector<1x128xf32>
    %26 = vector.broadcast %25 : vector<1x128xf32> to vector<16x128xf32>
    %27 = arith.addf %24, %26 : vector<16x128xf32>
    %cst_10 = arith.constant 0.000000e+00 : f32
    %28 = vector.broadcast %cst_10 : f32 to vector<16x128xf32>
    %29 = arith.maximumf %27, %28 : vector<16x128xf32>
    %cst_11 = arith.constant 0.000000e+00 : f32
    %30 = vector.broadcast %cst_11 : f32 to vector<1x128xf32>
    %c7 = arith.constant 7 : index
    %c0_12 = arith.constant 0 : index
    %31 = vector.load %arg9[%c7, %c0_12] : memref<32x128xf32, #tpu.memory_space<vmem>>, vector<1x128xf32>
    tpu.vector_store %arg9[%c7, %c0_12], %30 {strides = array<i32>} : memref<32x128xf32, #tpu.memory_space<vmem>>, vector<1x128xf32>,
    %c8 = arith.constant 8 : index
    %c0_13 = arith.constant 0 : index
    %32 = vector.load %arg9[%c8, %c0_13] : memref<32x128xf32, #tpu.memory_space<vmem>>, vector<16x128xf32>
    tpu.vector_store %arg9[%c8, %c0_13], %29 {strides = array<i32>} : memref<32x128xf32, #tpu.memory_space<vmem>>, vector<16x128xf32>,
    %c24 = arith.constant 24 : index
    %c0_14 = arith.constant 0 : index
    %33 = vector.load %arg9[%c24, %c0_14] : memref<32x128xf32, #tpu.memory_space<vmem>>, vector<1x128xf32>
    tpu.vector_store %arg9[%c24, %c0_14], %30 {strides = array<i32>} : memref<32x128xf32, #tpu.memory_space<vmem>>, vector<1x128xf32>,
    %cst_15 = arith.constant 0.000000e+00 : f32
    %34 = vector.broadcast %cst_15 : f32 to vector<8x128xf32>
    %c7_16 = arith.constant 7 : index
    %c0_17 = arith.constant 0 : index
    %35 = tpu.strided_load %arg9[%c7_16, %c0_17] {strides = array<i32: 2, 1>} : memref<32x128xf32, #tpu.memory_space<vmem>>, vector<8x128xf32>
    %36 = arith.truncf %35 : vector<8x128xf32> to vector<8x128xbf16>
    %c0_18 = arith.constant 0 : index
    %c0_19 = arith.constant 0 : index
    %c0_20 = arith.constant 0 : index
    %c0_21 = arith.constant 0 : index
    %37 = vector.load %arg3[%c0_18, %c0_19, %c0_20, %c0_21] : memref<8x3x128x128xbf16, #tpu.memory_space<vmem>>, vector<1x1x128x128xbf16>
    %38 = vector.shape_cast %37 : vector<1x1x128x128xbf16> to vector<128x128xbf16>
    %cst_22 = arith.constant dense<0.000000e+00> : vector<8x128xf32>
    %39 = tpu.matmul %36, %38, %cst_22 {dimension_numbers = #tpu.dot_dimension_numbers<[1], [0], [0], [1], [0, 0, 1, 1], [], []>} : vector<8x128xbf16>, vector<128x128xbf16>, vector<8x128xf32> -> vector<8x128xf32>
    %40 = arith.addf %34, %39 : vector<8x128xf32>
    %c8_23 = arith.constant 8 : index
    %c0_24 = arith.constant 0 : index
    %41 = tpu.strided_load %arg9[%c8_23, %c0_24] {strides = array<i32: 2, 1>} : memref<32x128xf32, #tpu.memory_space<vmem>>, vector<8x128xf32>
    %42 = arith.truncf %41 : vector<8x128xf32> to vector<8x128xbf16>
    %c0_25 = arith.constant 0 : index
    %c1_26 = arith.constant 1 : index
    %c0_27 = arith.constant 0 : index
    %c0_28 = arith.constant 0 : index
    %43 = vector.load %arg3[%c0_25, %c1_26, %c0_27, %c0_28] : memref<8x3x128x128xbf16, #tpu.memory_space<vmem>>, vector<1x1x128x128xbf16>
    %44 = vector.shape_cast %43 : vector<1x1x128x128xbf16> to vector<128x128xbf16>
    %cst_29 = arith.constant dense<0.000000e+00> : vector<8x128xf32>
    %45 = tpu.matmul %42, %44, %cst_29 {dimension_numbers = #tpu.dot_dimension_numbers<[1], [0], [0], [1], [0, 0, 1, 1], [], []>} : vector<8x128xbf16>, vector<128x128xbf16>, vector<8x128xf32> -> vector<8x128xf32>
    %46 = arith.addf %40, %45 : vector<8x128xf32>
    %c9 = arith.constant 9 : index
    %c0_30 = arith.constant 0 : index
    %47 = tpu.strided_load %arg9[%c9, %c0_30] {strides = array<i32: 2, 1>} : memref<32x128xf32, #tpu.memory_space<vmem>>, vector<8x128xf32>
    %48 = arith.truncf %47 : vector<8x128xf32> to vector<8x128xbf16>
    %c0_31 = arith.constant 0 : index
    %c2_32 = arith.constant 2 : index
    %c0_33 = arith.constant 0 : index
    %c0_34 = arith.constant 0 : index
    %49 = vector.load %arg3[%c0_31, %c2_32, %c0_33, %c0_34] : memref<8x3x128x128xbf16, #tpu.memory_space<vmem>>, vector<1x1x128x128xbf16>
    %50 = vector.shape_cast %49 : vector<1x1x128x128xbf16> to vector<128x128xbf16>
    %cst_35 = arith.constant dense<0.000000e+00> : vector<8x128xf32>
    %51 = tpu.matmul %48, %50, %cst_35 {dimension_numbers = #tpu.dot_dimension_numbers<[1], [0], [0], [1], [0, 0, 1, 1], [], []>} : vector<8x128xbf16>, vector<128x128xbf16>, vector<8x128xf32> -> vector<8x128xf32>
    %52 = arith.addf %46, %51 : vector<8x128xf32>
    %c1_36 = arith.constant 1 : index
    %c0_37 = arith.constant 0 : index
    %53 = vector.load %arg6[%c1_36, %c0_37] : memref<12x128xf32, #tpu.memory_space<vmem>>, vector<1x128xf32>
    %54 = vector.broadcast %53 : vector<1x128xf32> to vector<8x128xf32>
    %55 = arith.mulf %52, %54 : vector<8x128xf32>
    %c1_38 = arith.constant 1 : index
    %c0_39 = arith.constant 0 : index
    %56 = vector.load %arg7[%c1_38, %c0_39] : memref<12x128xf32, #tpu.memory_space<vmem>>, vector<1x128xf32>
    %57 = vector.broadcast %56 : vector<1x128xf32> to vector<8x128xf32>
    %58 = arith.addf %55, %57 : vector<8x128xf32>
    %cst_40 = arith.constant 0.000000e+00 : f32
    %59 = vector.broadcast %cst_40 : f32 to vector<8x128xf32>
    %60 = arith.maximumf %58, %59 : vector<8x128xf32>
    %cst_41 = arith.constant 0.000000e+00 : f32
    %61 = vector.broadcast %cst_41 : f32 to vector<1x128xf32>
    %c7_42 = arith.constant 7 : index
    %c0_43 = arith.constant 0 : index
    %62 = vector.load %arg11[%c7_42, %c0_43] : memref<24x128xf32, #tpu.memory_space<vmem>>, vector<1x128xf32>
    tpu.vector_store %arg11[%c7_42, %c0_43], %61 {strides = array<i32>} : memref<24x128xf32, #tpu.memory_space<vmem>>, vector<1x128xf32>,
    %c8_44 = arith.constant 8 : index
    %c0_45 = arith.constant 0 : index
    %63 = vector.load %arg11[%c8_44, %c0_45] : memref<24x128xf32, #tpu.memory_space<vmem>>, vector<8x128xf32>
    tpu.vector_store %arg11[%c8_44, %c0_45], %60 {strides = array<i32>} : memref<24x128xf32, #tpu.memory_space<vmem>>, vector<8x128xf32>,
    %c16 = arith.constant 16 : index
    %c0_46 = arith.constant 0 : index
    %64 = vector.load %arg11[%c16, %c0_46] : memref<24x128xf32, #tpu.memory_space<vmem>>, vector<1x128xf32>
    tpu.vector_store %arg11[%c16, %c0_46], %61 {strides = array<i32>} : memref<24x128xf32, #tpu.memory_space<vmem>>, vector<1x128xf32>,
    %c8_47 = arith.constant 8 : index
    %c0_48 = arith.constant 0 : index
    %65 = tpu.strided_load %arg9[%c8_47, %c0_48] {strides = array<i32: 2, 1>} : memref<32x128xf32, #tpu.memory_space<vmem>>, vector<8x128xf32>
    %66 = arith.truncf %65 : vector<8x128xf32> to vector<8x128xbf16>
    %c0_49 = arith.constant 0 : index
    %c0_50 = arith.constant 0 : index
    %c0_51 = arith.constant 0 : index
    %67 = vector.load %arg4[%c0_49, %c0_50, %c0_51] : memref<2x128x128xbf16, #tpu.memory_space<vmem>>, vector<1x128x128xbf16>
    %68 = vector.shape_cast %67 : vector<1x128x128xbf16> to vector<128x128xbf16>
    %cst_52 = arith.constant dense<0.000000e+00> : vector<8x128xf32>
    %69 = tpu.matmul %66, %68, %cst_52 {dimension_numbers = #tpu.dot_dimension_numbers<[1], [0], [0], [1], [0, 0, 1, 1], [], []>} : vector<8x128xbf16>, vector<128x128xbf16>, vector<8x128xf32> -> vector<8x128xf32>
    %c3 = arith.constant 3 : index
    %c0_53 = arith.constant 0 : index
    %70 = vector.load %arg6[%c3, %c0_53] : memref<12x128xf32, #tpu.memory_space<vmem>>, vector<1x128xf32>
    %71 = vector.broadcast %70 : vector<1x128xf32> to vector<8x128xf32>
    %72 = arith.mulf %69, %71 : vector<8x128xf32>
    %c3_54 = arith.constant 3 : index
    %c0_55 = arith.constant 0 : index
    %73 = vector.load %arg7[%c3_54, %c0_55] : memref<12x128xf32, #tpu.memory_space<vmem>>, vector<1x128xf32>
    %74 = vector.broadcast %73 : vector<1x128xf32> to vector<8x128xf32>
    %75 = arith.addf %72, %74 : vector<8x128xf32>
    %cst_56 = arith.constant 0.000000e+00 : f32
    %76 = vector.broadcast %cst_56 : f32 to vector<8x128xf32>
    %c7_57 = arith.constant 7 : index
    %c0_58 = arith.constant 0 : index
    %77 = vector.load %arg11[%c7_57, %c0_58] : memref<24x128xf32, #tpu.memory_space<vmem>>, vector<8x128xf32>
    %78 = arith.truncf %77 : vector<8x128xf32> to vector<8x128xbf16>
    %c1_59 = arith.constant 1 : index
    %c0_60 = arith.constant 0 : index
    %c0_61 = arith.constant 0 : index
    %c0_62 = arith.constant 0 : index
    %79 = vector.load %arg3[%c1_59, %c0_60, %c0_61, %c0_62] : memref<8x3x128x128xbf16, #tpu.memory_space<vmem>>, vector<1x1x128x128xbf16>
    %80 = vector.shape_cast %79 : vector<1x1x128x128xbf16> to vector<128x128xbf16>
    %cst_63 = arith.constant dense<0.000000e+00> : vector<8x128xf32>
    %81 = tpu.matmul %78, %80, %cst_63 {dimension_numbers = #tpu.dot_dimension_numbers<[1], [0], [0], [1], [0, 0, 1, 1], [], []>} : vector<8x128xbf16>, vector<128x128xbf16>, vector<8x128xf32> -> vector<8x128xf32>
    %82 = arith.addf %76, %81 : vector<8x128xf32>
    %c8_64 = arith.constant 8 : index
    %c0_65 = arith.constant 0 : index
    %83 = vector.load %arg11[%c8_64, %c0_65] : memref<24x128xf32, #tpu.memory_space<vmem>>, vector<8x128xf32>
    %84 = arith.truncf %83 : vector<8x128xf32> to vector<8x128xbf16>
    %c1_66 = arith.constant 1 : index
    %c1_67 = arith.constant 1 : index
    %c0_68 = arith.constant 0 : index
    %c0_69 = arith.constant 0 : index
    %85 = vector.load %arg3[%c1_66, %c1_67, %c0_68, %c0_69] : memref<8x3x128x128xbf16, #tpu.memory_space<vmem>>, vector<1x1x128x128xbf16>
    %86 = vector.shape_cast %85 : vector<1x1x128x128xbf16> to vector<128x128xbf16>
    %cst_70 = arith.constant dense<0.000000e+00> : vector<8x128xf32>
    %87 = tpu.matmul %84, %86, %cst_70 {dimension_numbers = #tpu.dot_dimension_numbers<[1], [0], [0], [1], [0, 0, 1, 1], [], []>} : vector<8x128xbf16>, vector<128x128xbf16>, vector<8x128xf32> -> vector<8x128xf32>
    %88 = arith.addf %82, %87 : vector<8x128xf32>
    %c9_71 = arith.constant 9 : index
    %c0_72 = arith.constant 0 : index
    %89 = vector.load %arg11[%c9_71, %c0_72] : memref<24x128xf32, #tpu.memory_space<vmem>>, vector<8x128xf32>
    %90 = arith.truncf %89 : vector<8x128xf32> to vector<8x128xbf16>
    %c1_73 = arith.constant 1 : index
    %c2_74 = arith.constant 2 : index
    %c0_75 = arith.constant 0 : index
    %c0_76 = arith.constant 0 : index
    %91 = vector.load %arg3[%c1_73, %c2_74, %c0_75, %c0_76] : memref<8x3x128x128xbf16, #tpu.memory_space<vmem>>, vector<1x1x128x128xbf16>
    %92 = vector.shape_cast %91 : vector<1x1x128x128xbf16> to vector<128x128xbf16>
    %cst_77 = arith.constant dense<0.000000e+00> : vector<8x128xf32>
    %93 = tpu.matmul %90, %92, %cst_77 {dimension_numbers = #tpu.dot_dimension_numbers<[1], [0], [0], [1], [0, 0, 1, 1], [], []>} : vector<8x128xbf16>, vector<128x128xbf16>, vector<8x128xf32> -> vector<8x128xf32>
    %94 = arith.addf %88, %93 : vector<8x128xf32>
    %c2_78 = arith.constant 2 : index
    %c0_79 = arith.constant 0 : index
    %95 = vector.load %arg6[%c2_78, %c0_79] : memref<12x128xf32, #tpu.memory_space<vmem>>, vector<1x128xf32>
    %96 = vector.broadcast %95 : vector<1x128xf32> to vector<8x128xf32>
    %97 = arith.mulf %94, %96 : vector<8x128xf32>
    %c2_80 = arith.constant 2 : index
    %c0_81 = arith.constant 0 : index
    %98 = vector.load %arg7[%c2_80, %c0_81] : memref<12x128xf32, #tpu.memory_space<vmem>>, vector<1x128xf32>
    %99 = vector.broadcast %98 : vector<1x128xf32> to vector<8x128xf32>
    %100 = arith.addf %97, %99 : vector<8x128xf32>
    %101 = arith.addf %100, %75 : vector<8x128xf32>
    %cst_82 = arith.constant 0.000000e+00 : f32
    %102 = vector.broadcast %cst_82 : f32 to vector<8x128xf32>
    %103 = arith.maximumf %101, %102 : vector<8x128xf32>
    %cst_83 = arith.constant 0.000000e+00 : f32
    %104 = vector.broadcast %cst_83 : f32 to vector<1x128xf32>
    %c7_84 = arith.constant 7 : index
    %c0_85 = arith.constant 0 : index
    %105 = vector.load %arg10[%c7_84, %c0_85] : memref<24x128xf32, #tpu.memory_space<vmem>>, vector<1x128xf32>
    tpu.vector_store %arg10[%c7_84, %c0_85], %104 {strides = array<i32>} : memref<24x128xf32, #tpu.memory_space<vmem>>, vector<1x128xf32>,
    %c8_86 = arith.constant 8 : index
    %c0_87 = arith.constant 0 : index
    %106 = vector.load %arg10[%c8_86, %c0_87] : memref<24x128xf32, #tpu.memory_space<vmem>>, vector<8x128xf32>
    tpu.vector_store %arg10[%c8_86, %c0_87], %103 {strides = array<i32>} : memref<24x128xf32, #tpu.memory_space<vmem>>, vector<8x128xf32>,
    %c16_88 = arith.constant 16 : index
    %c0_89 = arith.constant 0 : index
    %107 = vector.load %arg10[%c16_88, %c0_89] : memref<24x128xf32, #tpu.memory_space<vmem>>, vector<1x128xf32>
    tpu.vector_store %arg10[%c16_88, %c0_89], %104 {strides = array<i32>} : memref<24x128xf32, #tpu.memory_space<vmem>>, vector<1x128xf32>,
    %cst_90 = arith.constant 0.000000e+00 : f32
    %108 = vector.broadcast %cst_90 : f32 to vector<8x128xf32>
    %c7_91 = arith.constant 7 : index
    %c0_92 = arith.constant 0 : index
    %109 = vector.load %arg10[%c7_91, %c0_92] : memref<24x128xf32, #tpu.memory_space<vmem>>, vector<8x128xf32>
    %110 = arith.truncf %109 : vector<8x128xf32> to vector<8x128xbf16>
    %c2_93 = arith.constant 2 : index
    %c0_94 = arith.constant 0 : index
    %c0_95 = arith.constant 0 : index
    %c0_96 = arith.constant 0 : index
    %111 = vector.load %arg3[%c2_93, %c0_94, %c0_95, %c0_96] : memref<8x3x128x128xbf16, #tpu.memory_space<vmem>>, vector<1x1x128x128xbf16>
    %112 = vector.shape_cast %111 : vector<1x1x128x128xbf16> to vector<128x128xbf16>
    %cst_97 = arith.constant dense<0.000000e+00> : vector<8x128xf32>
    %113 = tpu.matmul %110, %112, %cst_97 {dimension_numbers = #tpu.dot_dimension_numbers<[1], [0], [0], [1], [0, 0, 1, 1], [], []>} : vector<8x128xbf16>, vector<128x128xbf16>, vector<8x128xf32> -> vector<8x128xf32>
    %114 = arith.addf %108, %113 : vector<8x128xf32>
    %c8_98 = arith.constant 8 : index
    %c0_99 = arith.constant 0 : index
    %115 = vector.load %arg10[%c8_98, %c0_99] : memref<24x128xf32, #tpu.memory_space<vmem>>, vector<8x128xf32>
    %116 = arith.truncf %115 : vector<8x128xf32> to vector<8x128xbf16>
    %c2_100 = arith.constant 2 : index
    %c1_101 = arith.constant 1 : index
    %c0_102 = arith.constant 0 : index
    %c0_103 = arith.constant 0 : index
    %117 = vector.load %arg3[%c2_100, %c1_101, %c0_102, %c0_103] : memref<8x3x128x128xbf16, #tpu.memory_space<vmem>>, vector<1x1x128x128xbf16>
    %118 = vector.shape_cast %117 : vector<1x1x128x128xbf16> to vector<128x128xbf16>
    %cst_104 = arith.constant dense<0.000000e+00> : vector<8x128xf32>
    %119 = tpu.matmul %116, %118, %cst_104 {dimension_numbers = #tpu.dot_dimension_numbers<[1], [0], [0], [1], [0, 0, 1, 1], [], []>} : vector<8x128xbf16>, vector<128x128xbf16>, vector<8x128xf32> -> vector<8x128xf32>
    %120 = arith.addf %114, %119 : vector<8x128xf32>
    %c9_105 = arith.constant 9 : index
    %c0_106 = arith.constant 0 : index
    %121 = vector.load %arg10[%c9_105, %c0_106] : memref<24x128xf32, #tpu.memory_space<vmem>>, vector<8x128xf32>
    %122 = arith.truncf %121 : vector<8x128xf32> to vector<8x128xbf16>
    %c2_107 = arith.constant 2 : index
    %c2_108 = arith.constant 2 : index
    %c0_109 = arith.constant 0 : index
    %c0_110 = arith.constant 0 : index
    %123 = vector.load %arg3[%c2_107, %c2_108, %c0_109, %c0_110] : memref<8x3x128x128xbf16, #tpu.memory_space<vmem>>, vector<1x1x128x128xbf16>
    %124 = vector.shape_cast %123 : vector<1x1x128x128xbf16> to vector<128x128xbf16>
    %cst_111 = arith.constant dense<0.000000e+00> : vector<8x128xf32>
    %125 = tpu.matmul %122, %124, %cst_111 {dimension_numbers = #tpu.dot_dimension_numbers<[1], [0], [0], [1], [0, 0, 1, 1], [], []>} : vector<8x128xbf16>, vector<128x128xbf16>, vector<8x128xf32> -> vector<8x128xf32>
    %126 = arith.addf %120, %125 : vector<8x128xf32>
    %c4 = arith.constant 4 : index
    %c0_112 = arith.constant 0 : index
    %127 = vector.load %arg6[%c4, %c0_112] : memref<12x128xf32, #tpu.memory_space<vmem>>, vector<1x128xf32>
    %128 = vector.broadcast %127 : vector<1x128xf32> to vector<8x128xf32>
    %129 = arith.mulf %126, %128 : vector<8x128xf32>
    %c4_113 = arith.constant 4 : index
    %c0_114 = arith.constant 0 : index
    %130 = vector.load %arg7[%c4_113, %c0_114] : memref<12x128xf32, #tpu.memory_space<vmem>>, vector<1x128xf32>
    %131 = vector.broadcast %130 : vector<1x128xf32> to vector<8x128xf32>
    %132 = arith.addf %129, %131 : vector<8x128xf32>
    %cst_115 = arith.constant 0.000000e+00 : f32
    %133 = vector.broadcast %cst_115 : f32 to vector<8x128xf32>
    %134 = arith.maximumf %132, %133 : vector<8x128xf32>
    %cst_116 = arith.constant 0.000000e+00 : f32
    %135 = vector.broadcast %cst_116 : f32 to vector<1x128xf32>
    %c7_117 = arith.constant 7 : index
    %c0_118 = arith.constant 0 : index
    %136 = vector.load %arg11[%c7_117, %c0_118] : memref<24x128xf32, #tpu.memory_space<vmem>>, vector<1x128xf32>
    tpu.vector_store %arg11[%c7_117, %c0_118], %135 {strides = array<i32>} : memref<24x128xf32, #tpu.memory_space<vmem>>, vector<1x128xf32>,
    %c8_119 = arith.constant 8 : index
    %c0_120 = arith.constant 0 : index
    %137 = vector.load %arg11[%c8_119, %c0_120] : memref<24x128xf32, #tpu.memory_space<vmem>>, vector<8x128xf32>
    tpu.vector_store %arg11[%c8_119, %c0_120], %134 {strides = array<i32>} : memref<24x128xf32, #tpu.memory_space<vmem>>, vector<8x128xf32>,
    %c16_121 = arith.constant 16 : index
    %c0_122 = arith.constant 0 : index
    %138 = vector.load %arg11[%c16_121, %c0_122] : memref<24x128xf32, #tpu.memory_space<vmem>>, vector<1x128xf32>
    tpu.vector_store %arg11[%c16_121, %c0_122], %135 {strides = array<i32>} : memref<24x128xf32, #tpu.memory_space<vmem>>, vector<1x128xf32>,
    %c8_123 = arith.constant 8 : index
    %c0_124 = arith.constant 0 : index
    %139 = vector.load %arg10[%c8_123, %c0_124] : memref<24x128xf32, #tpu.memory_space<vmem>>, vector<8x128xf32>
    %cst_125 = arith.constant 0.000000e+00 : f32
    %140 = vector.broadcast %cst_125 : f32 to vector<8x128xf32>
    %c7_126 = arith.constant 7 : index
    %c0_127 = arith.constant 0 : index
    %141 = vector.load %arg11[%c7_126, %c0_127] : memref<24x128xf32, #tpu.memory_space<vmem>>, vector<8x128xf32>
    %142 = arith.truncf %141 : vector<8x128xf32> to vector<8x128xbf16>
    %c3_128 = arith.constant 3 : index
    %c0_129 = arith.constant 0 : index
    %c0_130 = arith.constant 0 : index
    %c0_131 = arith.constant 0 : index
    %143 = vector.load %arg3[%c3_128, %c0_129, %c0_130, %c0_131] : memref<8x3x128x128xbf16, #tpu.memory_space<vmem>>, vector<1x1x128x128xbf16>
    %144 = vector.shape_cast %143 : vector<1x1x128x128xbf16> to vector<128x128xbf16>
    %cst_132 = arith.constant dense<0.000000e+00> : vector<8x128xf32>
    %145 = tpu.matmul %142, %144, %cst_132 {dimension_numbers = #tpu.dot_dimension_numbers<[1], [0], [0], [1], [0, 0, 1, 1], [], []>} : vector<8x128xbf16>, vector<128x128xbf16>, vector<8x128xf32> -> vector<8x128xf32>
    %146 = arith.addf %140, %145 : vector<8x128xf32>
    %c8_133 = arith.constant 8 : index
    %c0_134 = arith.constant 0 : index
    %147 = vector.load %arg11[%c8_133, %c0_134] : memref<24x128xf32, #tpu.memory_space<vmem>>, vector<8x128xf32>
    %148 = arith.truncf %147 : vector<8x128xf32> to vector<8x128xbf16>
    %c3_135 = arith.constant 3 : index
    %c1_136 = arith.constant 1 : index
    %c0_137 = arith.constant 0 : index
    %c0_138 = arith.constant 0 : index
    %149 = vector.load %arg3[%c3_135, %c1_136, %c0_137, %c0_138] : memref<8x3x128x128xbf16, #tpu.memory_space<vmem>>, vector<1x1x128x128xbf16>
    %150 = vector.shape_cast %149 : vector<1x1x128x128xbf16> to vector<128x128xbf16>
    %cst_139 = arith.constant dense<0.000000e+00> : vector<8x128xf32>
    %151 = tpu.matmul %148, %150, %cst_139 {dimension_numbers = #tpu.dot_dimension_numbers<[1], [0], [0], [1], [0, 0, 1, 1], [], []>} : vector<8x128xbf16>, vector<128x128xbf16>, vector<8x128xf32> -> vector<8x128xf32>
    %152 = arith.addf %146, %151 : vector<8x128xf32>
    %c9_140 = arith.constant 9 : index
    %c0_141 = arith.constant 0 : index
    %153 = vector.load %arg11[%c9_140, %c0_141] : memref<24x128xf32, #tpu.memory_space<vmem>>, vector<8x128xf32>
    %154 = arith.truncf %153 : vector<8x128xf32> to vector<8x128xbf16>
    %c3_142 = arith.constant 3 : index
    %c2_143 = arith.constant 2 : index
    %c0_144 = arith.constant 0 : index
    %c0_145 = arith.constant 0 : index
    %155 = vector.load %arg3[%c3_142, %c2_143, %c0_144, %c0_145] : memref<8x3x128x128xbf16, #tpu.memory_space<vmem>>, vector<1x1x128x128xbf16>
    %156 = vector.shape_cast %155 : vector<1x1x128x128xbf16> to vector<128x128xbf16>
    %cst_146 = arith.constant dense<0.000000e+00> : vector<8x128xf32>
    %157 = tpu.matmul %154, %156, %cst_146 {dimension_numbers = #tpu.dot_dimension_numbers<[1], [0], [0], [1], [0, 0, 1, 1], [], []>} : vector<8x128xbf16>, vector<128x128xbf16>, vector<8x128xf32> -> vector<8x128xf32>
    %158 = arith.addf %152, %157 : vector<8x128xf32>
    %c5 = arith.constant 5 : index
    %c0_147 = arith.constant 0 : index
    %159 = vector.load %arg6[%c5, %c0_147] : memref<12x128xf32, #tpu.memory_space<vmem>>, vector<1x128xf32>
    %160 = vector.broadcast %159 : vector<1x128xf32> to vector<8x128xf32>
    %161 = arith.mulf %158, %160 : vector<8x128xf32>
    %c5_148 = arith.constant 5 : index
    %c0_149 = arith.constant 0 : index
    %162 = vector.load %arg7[%c5_148, %c0_149] : memref<12x128xf32, #tpu.memory_space<vmem>>, vector<1x128xf32>
    %163 = vector.broadcast %162 : vector<1x128xf32> to vector<8x128xf32>
    %164 = arith.addf %161, %163 : vector<8x128xf32>
    %165 = arith.addf %164, %139 : vector<8x128xf32>
    %cst_150 = arith.constant 0.000000e+00 : f32
    %166 = vector.broadcast %cst_150 : f32 to vector<8x128xf32>
    %167 = arith.maximumf %165, %166 : vector<8x128xf32>
    %cst_151 = arith.constant 0.000000e+00 : f32
    %168 = vector.broadcast %cst_151 : f32 to vector<1x128xf32>
    %c7_152 = arith.constant 7 : index
    %c0_153 = arith.constant 0 : index
    %169 = vector.load %arg10[%c7_152, %c0_153] : memref<24x128xf32, #tpu.memory_space<vmem>>, vector<1x128xf32>
    tpu.vector_store %arg10[%c7_152, %c0_153], %168 {strides = array<i32>} : memref<24x128xf32, #tpu.memory_space<vmem>>, vector<1x128xf32>,
    %c8_154 = arith.constant 8 : index
    %c0_155 = arith.constant 0 : index
    %170 = vector.load %arg10[%c8_154, %c0_155] : memref<24x128xf32, #tpu.memory_space<vmem>>, vector<8x128xf32>
    tpu.vector_store %arg10[%c8_154, %c0_155], %167 {strides = array<i32>} : memref<24x128xf32, #tpu.memory_space<vmem>>, vector<8x128xf32>,
    %c16_156 = arith.constant 16 : index
    %c0_157 = arith.constant 0 : index
    %171 = vector.load %arg10[%c16_156, %c0_157] : memref<24x128xf32, #tpu.memory_space<vmem>>, vector<1x128xf32>
    tpu.vector_store %arg10[%c16_156, %c0_157], %168 {strides = array<i32>} : memref<24x128xf32, #tpu.memory_space<vmem>>, vector<1x128xf32>,
    %cst_158 = arith.constant 0.000000e+00 : f32
    %172 = vector.broadcast %cst_158 : f32 to vector<4x128xf32>
    %c7_159 = arith.constant 7 : index
    %c0_160 = arith.constant 0 : index
    %173 = tpu.strided_load %arg10[%c7_159, %c0_160] {strides = array<i32: 2, 1>} : memref<24x128xf32, #tpu.memory_space<vmem>>, vector<4x128xf32>
    %174 = arith.truncf %173 : vector<4x128xf32> to vector<4x128xbf16>
    %c4_161 = arith.constant 4 : index
    %c0_162 = arith.constant 0 : index
    %c0_163 = arith.constant 0 : index
    %c0_164 = arith.constant 0 : index
    %175 = vector.load %arg3[%c4_161, %c0_162, %c0_163, %c0_164] : memref<8x3x128x128xbf16, #tpu.memory_space<vmem>>, vector<1x1x128x128xbf16>
    %176 = vector.shape_cast %175 : vector<1x1x128x128xbf16> to vector<128x128xbf16>
    %cst_165 = arith.constant dense<0.000000e+00> : vector<4x128xf32>
    %177 = tpu.matmul %174, %176, %cst_165 {dimension_numbers = #tpu.dot_dimension_numbers<[1], [0], [0], [1], [0, 0, 1, 1], [], []>} : vector<4x128xbf16>, vector<128x128xbf16>, vector<4x128xf32> -> vector<4x128xf32>
    %178 = arith.addf %172, %177 : vector<4x128xf32>
    %c8_166 = arith.constant 8 : index
    %c0_167 = arith.constant 0 : index
    %179 = tpu.strided_load %arg10[%c8_166, %c0_167] {strides = array<i32: 2, 1>} : memref<24x128xf32, #tpu.memory_space<vmem>>, vector<4x128xf32>
    %180 = arith.truncf %179 : vector<4x128xf32> to vector<4x128xbf16>
    %c4_168 = arith.constant 4 : index
    %c1_169 = arith.constant 1 : index
    %c0_170 = arith.constant 0 : index
    %c0_171 = arith.constant 0 : index
    %181 = vector.load %arg3[%c4_168, %c1_169, %c0_170, %c0_171] : memref<8x3x128x128xbf16, #tpu.memory_space<vmem>>, vector<1x1x128x128xbf16>
    %182 = vector.shape_cast %181 : vector<1x1x128x128xbf16> to vector<128x128xbf16>
    %cst_172 = arith.constant dense<0.000000e+00> : vector<4x128xf32>
    %183 = tpu.matmul %180, %182, %cst_172 {dimension_numbers = #tpu.dot_dimension_numbers<[1], [0], [0], [1], [0, 0, 1, 1], [], []>} : vector<4x128xbf16>, vector<128x128xbf16>, vector<4x128xf32> -> vector<4x128xf32>
    %184 = arith.addf %178, %183 : vector<4x128xf32>
    %c9_173 = arith.constant 9 : index
    %c0_174 = arith.constant 0 : index
    %185 = tpu.strided_load %arg10[%c9_173, %c0_174] {strides = array<i32: 2, 1>} : memref<24x128xf32, #tpu.memory_space<vmem>>, vector<4x128xf32>
    %186 = arith.truncf %185 : vector<4x128xf32> to vector<4x128xbf16>
    %c4_175 = arith.constant 4 : index
    %c2_176 = arith.constant 2 : index
    %c0_177 = arith.constant 0 : index
    %c0_178 = arith.constant 0 : index
    %187 = vector.load %arg3[%c4_175, %c2_176, %c0_177, %c0_178] : memref<8x3x128x128xbf16, #tpu.memory_space<vmem>>, vector<1x1x128x128xbf16>
    %188 = vector.shape_cast %187 : vector<1x1x128x128xbf16> to vector<128x128xbf16>
    %cst_179 = arith.constant dense<0.000000e+00> : vector<4x128xf32>
    %189 = tpu.matmul %186, %188, %cst_179 {dimension_numbers = #tpu.dot_dimension_numbers<[1], [0], [0], [1], [0, 0, 1, 1], [], []>} : vector<4x128xbf16>, vector<128x128xbf16>, vector<4x128xf32> -> vector<4x128xf32>
    %190 = arith.addf %184, %189 : vector<4x128xf32>
    %c6 = arith.constant 6 : index
    %c0_180 = arith.constant 0 : index
    %191 = vector.load %arg6[%c6, %c0_180] : memref<12x128xf32, #tpu.memory_space<vmem>>, vector<1x128xf32>
    %192 = vector.broadcast %191 : vector<1x128xf32> to vector<4x128xf32>
    %193 = arith.mulf %190, %192 : vector<4x128xf32>
    %c6_181 = arith.constant 6 : index
    %c0_182 = arith.constant 0 : index
    %194 = vector.load %arg7[%c6_181, %c0_182] : memref<12x128xf32, #tpu.memory_space<vmem>>, vector<1x128xf32>
    %195 = vector.broadcast %194 : vector<1x128xf32> to vector<4x128xf32>
    %196 = arith.addf %193, %195 : vector<4x128xf32>
    %cst_183 = arith.constant 0.000000e+00 : f32
    %197 = vector.broadcast %cst_183 : f32 to vector<4x128xf32>
    %198 = arith.maximumf %196, %197 : vector<4x128xf32>
    %cst_184 = arith.constant 0.000000e+00 : f32
    %199 = vector.broadcast %cst_184 : f32 to vector<1x128xf32>
    %c7_185 = arith.constant 7 : index
    %c0_186 = arith.constant 0 : index
    %200 = vector.load %arg13[%c7_185, %c0_186] : memref<20x128xf32, #tpu.memory_space<vmem>>, vector<1x128xf32>
    tpu.vector_store %arg13[%c7_185, %c0_186], %199 {strides = array<i32>} : memref<20x128xf32, #tpu.memory_space<vmem>>, vector<1x128xf32>,
    %c8_187 = arith.constant 8 : index
    %c0_188 = arith.constant 0 : index
    %201 = vector.load %arg13[%c8_187, %c0_188] : memref<20x128xf32, #tpu.memory_space<vmem>>, vector<4x128xf32>
    tpu.vector_store %arg13[%c8_187, %c0_188], %198 {strides = array<i32>} : memref<20x128xf32, #tpu.memory_space<vmem>>, vector<4x128xf32>,
    %c12 = arith.constant 12 : index
    %c0_189 = arith.constant 0 : index
    %202 = vector.load %arg13[%c12, %c0_189] : memref<20x128xf32, #tpu.memory_space<vmem>>, vector<1x128xf32>
    tpu.vector_store %arg13[%c12, %c0_189], %199 {strides = array<i32>} : memref<20x128xf32, #tpu.memory_space<vmem>>, vector<1x128xf32>,
    %c8_190 = arith.constant 8 : index
    %c0_191 = arith.constant 0 : index
    %203 = tpu.strided_load %arg10[%c8_190, %c0_191] {strides = array<i32: 2, 1>} : memref<24x128xf32, #tpu.memory_space<vmem>>, vector<4x128xf32>
    %204 = arith.truncf %203 : vector<4x128xf32> to vector<4x128xbf16>
    %c1_192 = arith.constant 1 : index
    %c0_193 = arith.constant 0 : index
    %c0_194 = arith.constant 0 : index
    %205 = vector.load %arg4[%c1_192, %c0_193, %c0_194] : memref<2x128x128xbf16, #tpu.memory_space<vmem>>, vector<1x128x128xbf16>
    %206 = vector.shape_cast %205 : vector<1x128x128xbf16> to vector<128x128xbf16>
    %cst_195 = arith.constant dense<0.000000e+00> : vector<4x128xf32>
    %207 = tpu.matmul %204, %206, %cst_195 {dimension_numbers = #tpu.dot_dimension_numbers<[1], [0], [0], [1], [0, 0, 1, 1], [], []>} : vector<4x128xbf16>, vector<128x128xbf16>, vector<4x128xf32> -> vector<4x128xf32>
    %c8_196 = arith.constant 8 : index
    %c0_197 = arith.constant 0 : index
    %208 = vector.load %arg6[%c8_196, %c0_197] : memref<12x128xf32, #tpu.memory_space<vmem>>, vector<1x128xf32>
    %209 = vector.broadcast %208 : vector<1x128xf32> to vector<4x128xf32>
    %210 = arith.mulf %207, %209 : vector<4x128xf32>
    %c8_198 = arith.constant 8 : index
    %c0_199 = arith.constant 0 : index
    %211 = vector.load %arg7[%c8_198, %c0_199] : memref<12x128xf32, #tpu.memory_space<vmem>>, vector<1x128xf32>
    %212 = vector.broadcast %211 : vector<1x128xf32> to vector<4x128xf32>
    %213 = arith.addf %210, %212 : vector<4x128xf32>
    %cst_200 = arith.constant 0.000000e+00 : f32
    %214 = vector.broadcast %cst_200 : f32 to vector<4x128xf32>
    %c7_201 = arith.constant 7 : index
    %c0_202 = arith.constant 0 : index
    %215 = vector.load %arg13[%c7_201, %c0_202] : memref<20x128xf32, #tpu.memory_space<vmem>>, vector<4x128xf32>
    %216 = arith.truncf %215 : vector<4x128xf32> to vector<4x128xbf16>
    %c5_203 = arith.constant 5 : index
    %c0_204 = arith.constant 0 : index
    %c0_205 = arith.constant 0 : index
    %c0_206 = arith.constant 0 : index
    %217 = vector.load %arg3[%c5_203, %c0_204, %c0_205, %c0_206] : memref<8x3x128x128xbf16, #tpu.memory_space<vmem>>, vector<1x1x128x128xbf16>
    %218 = vector.shape_cast %217 : vector<1x1x128x128xbf16> to vector<128x128xbf16>
    %cst_207 = arith.constant dense<0.000000e+00> : vector<4x128xf32>
    %219 = tpu.matmul %216, %218, %cst_207 {dimension_numbers = #tpu.dot_dimension_numbers<[1], [0], [0], [1], [0, 0, 1, 1], [], []>} : vector<4x128xbf16>, vector<128x128xbf16>, vector<4x128xf32> -> vector<4x128xf32>
    %220 = arith.addf %214, %219 : vector<4x128xf32>
    %c8_208 = arith.constant 8 : index
    %c0_209 = arith.constant 0 : index
    %221 = vector.load %arg13[%c8_208, %c0_209] : memref<20x128xf32, #tpu.memory_space<vmem>>, vector<4x128xf32>
    %222 = arith.truncf %221 : vector<4x128xf32> to vector<4x128xbf16>
    %c5_210 = arith.constant 5 : index
    %c1_211 = arith.constant 1 : index
    %c0_212 = arith.constant 0 : index
    %c0_213 = arith.constant 0 : index
    %223 = vector.load %arg3[%c5_210, %c1_211, %c0_212, %c0_213] : memref<8x3x128x128xbf16, #tpu.memory_space<vmem>>, vector<1x1x128x128xbf16>
    %224 = vector.shape_cast %223 : vector<1x1x128x128xbf16> to vector<128x128xbf16>
    %cst_214 = arith.constant dense<0.000000e+00> : vector<4x128xf32>
    %225 = tpu.matmul %222, %224, %cst_214 {dimension_numbers = #tpu.dot_dimension_numbers<[1], [0], [0], [1], [0, 0, 1, 1], [], []>} : vector<4x128xbf16>, vector<128x128xbf16>, vector<4x128xf32> -> vector<4x128xf32>
    %226 = arith.addf %220, %225 : vector<4x128xf32>
    %c9_215 = arith.constant 9 : index
    %c0_216 = arith.constant 0 : index
    %227 = vector.load %arg13[%c9_215, %c0_216] : memref<20x128xf32, #tpu.memory_space<vmem>>, vector<4x128xf32>
    %228 = arith.truncf %227 : vector<4x128xf32> to vector<4x128xbf16>
    %c5_217 = arith.constant 5 : index
    %c2_218 = arith.constant 2 : index
    %c0_219 = arith.constant 0 : index
    %c0_220 = arith.constant 0 : index
    %229 = vector.load %arg3[%c5_217, %c2_218, %c0_219, %c0_220] : memref<8x3x128x128xbf16, #tpu.memory_space<vmem>>, vector<1x1x128x128xbf16>
    %230 = vector.shape_cast %229 : vector<1x1x128x128xbf16> to vector<128x128xbf16>
    %cst_221 = arith.constant dense<0.000000e+00> : vector<4x128xf32>
    %231 = tpu.matmul %228, %230, %cst_221 {dimension_numbers = #tpu.dot_dimension_numbers<[1], [0], [0], [1], [0, 0, 1, 1], [], []>} : vector<4x128xbf16>, vector<128x128xbf16>, vector<4x128xf32> -> vector<4x128xf32>
    %232 = arith.addf %226, %231 : vector<4x128xf32>
    %c7_222 = arith.constant 7 : index
    %c0_223 = arith.constant 0 : index
    %233 = vector.load %arg6[%c7_222, %c0_223] : memref<12x128xf32, #tpu.memory_space<vmem>>, vector<1x128xf32>
    %234 = vector.broadcast %233 : vector<1x128xf32> to vector<4x128xf32>
    %235 = arith.mulf %232, %234 : vector<4x128xf32>
    %c7_224 = arith.constant 7 : index
    %c0_225 = arith.constant 0 : index
    %236 = vector.load %arg7[%c7_224, %c0_225] : memref<12x128xf32, #tpu.memory_space<vmem>>, vector<1x128xf32>
    %237 = vector.broadcast %236 : vector<1x128xf32> to vector<4x128xf32>
    %238 = arith.addf %235, %237 : vector<4x128xf32>
    %239 = arith.addf %238, %213 : vector<4x128xf32>
    %cst_226 = arith.constant 0.000000e+00 : f32
    %240 = vector.broadcast %cst_226 : f32 to vector<4x128xf32>
    %241 = arith.maximumf %239, %240 : vector<4x128xf32>
    %cst_227 = arith.constant 0.000000e+00 : f32
    %242 = vector.broadcast %cst_227 : f32 to vector<1x128xf32>
    %c7_228 = arith.constant 7 : index
    %c0_229 = arith.constant 0 : index
    %243 = vector.load %arg12[%c7_228, %c0_229] : memref<20x128xf32, #tpu.memory_space<vmem>>, vector<1x128xf32>
    tpu.vector_store %arg12[%c7_228, %c0_229], %242 {strides = array<i32>} : memref<20x128xf32, #tpu.memory_space<vmem>>, vector<1x128xf32>,
    %c8_230 = arith.constant 8 : index
    %c0_231 = arith.constant 0 : index
    %244 = vector.load %arg12[%c8_230, %c0_231] : memref<20x128xf32, #tpu.memory_space<vmem>>, vector<4x128xf32>
    tpu.vector_store %arg12[%c8_230, %c0_231], %241 {strides = array<i32>} : memref<20x128xf32, #tpu.memory_space<vmem>>, vector<4x128xf32>,
    %c12_232 = arith.constant 12 : index
    %c0_233 = arith.constant 0 : index
    %245 = vector.load %arg12[%c12_232, %c0_233] : memref<20x128xf32, #tpu.memory_space<vmem>>, vector<1x128xf32>
    tpu.vector_store %arg12[%c12_232, %c0_233], %242 {strides = array<i32>} : memref<20x128xf32, #tpu.memory_space<vmem>>, vector<1x128xf32>,
    %cst_234 = arith.constant 0.000000e+00 : f32
    %246 = vector.broadcast %cst_234 : f32 to vector<4x128xf32>
    %c7_235 = arith.constant 7 : index
    %c0_236 = arith.constant 0 : index
    %247 = vector.load %arg12[%c7_235, %c0_236] : memref<20x128xf32, #tpu.memory_space<vmem>>, vector<4x128xf32>
    %248 = arith.truncf %247 : vector<4x128xf32> to vector<4x128xbf16>
    %c6_237 = arith.constant 6 : index
    %c0_238 = arith.constant 0 : index
    %c0_239 = arith.constant 0 : index
    %c0_240 = arith.constant 0 : index
    %249 = vector.load %arg3[%c6_237, %c0_238, %c0_239, %c0_240] : memref<8x3x128x128xbf16, #tpu.memory_space<vmem>>, vector<1x1x128x128xbf16>
    %250 = vector.shape_cast %249 : vector<1x1x128x128xbf16> to vector<128x128xbf16>
    %cst_241 = arith.constant dense<0.000000e+00> : vector<4x128xf32>
    %251 = tpu.matmul %248, %250, %cst_241 {dimension_numbers = #tpu.dot_dimension_numbers<[1], [0], [0], [1], [0, 0, 1, 1], [], []>} : vector<4x128xbf16>, vector<128x128xbf16>, vector<4x128xf32> -> vector<4x128xf32>
    %252 = arith.addf %246, %251 : vector<4x128xf32>
    %c8_242 = arith.constant 8 : index
    %c0_243 = arith.constant 0 : index
    %253 = vector.load %arg12[%c8_242, %c0_243] : memref<20x128xf32, #tpu.memory_space<vmem>>, vector<4x128xf32>
    %254 = arith.truncf %253 : vector<4x128xf32> to vector<4x128xbf16>
    %c6_244 = arith.constant 6 : index
    %c1_245 = arith.constant 1 : index
    %c0_246 = arith.constant 0 : index
    %c0_247 = arith.constant 0 : index
    %255 = vector.load %arg3[%c6_244, %c1_245, %c0_246, %c0_247] : memref<8x3x128x128xbf16, #tpu.memory_space<vmem>>, vector<1x1x128x128xbf16>
    %256 = vector.shape_cast %255 : vector<1x1x128x128xbf16> to vector<128x128xbf16>
    %cst_248 = arith.constant dense<0.000000e+00> : vector<4x128xf32>
    %257 = tpu.matmul %254, %256, %cst_248 {dimension_numbers = #tpu.dot_dimension_numbers<[1], [0], [0], [1], [0, 0, 1, 1], [], []>} : vector<4x128xbf16>, vector<128x128xbf16>, vector<4x128xf32> -> vector<4x128xf32>
    %258 = arith.addf %252, %257 : vector<4x128xf32>
    %c9_249 = arith.constant 9 : index
    %c0_250 = arith.constant 0 : index
    %259 = vector.load %arg12[%c9_249, %c0_250] : memref<20x128xf32, #tpu.memory_space<vmem>>, vector<4x128xf32>
    %260 = arith.truncf %259 : vector<4x128xf32> to vector<4x128xbf16>
    %c6_251 = arith.constant 6 : index
    %c2_252 = arith.constant 2 : index
    %c0_253 = arith.constant 0 : index
    %c0_254 = arith.constant 0 : index
    %261 = vector.load %arg3[%c6_251, %c2_252, %c0_253, %c0_254] : memref<8x3x128x128xbf16, #tpu.memory_space<vmem>>, vector<1x1x128x128xbf16>
    %262 = vector.shape_cast %261 : vector<1x1x128x128xbf16> to vector<128x128xbf16>
    %cst_255 = arith.constant dense<0.000000e+00> : vector<4x128xf32>
    %263 = tpu.matmul %260, %262, %cst_255 {dimension_numbers = #tpu.dot_dimension_numbers<[1], [0], [0], [1], [0, 0, 1, 1], [], []>} : vector<4x128xbf16>, vector<128x128xbf16>, vector<4x128xf32> -> vector<4x128xf32>
    %264 = arith.addf %258, %263 : vector<4x128xf32>
    %c9_256 = arith.constant 9 : index
    %c0_257 = arith.constant 0 : index
    %265 = vector.load %arg6[%c9_256, %c0_257] : memref<12x128xf32, #tpu.memory_space<vmem>>, vector<1x128xf32>
    %266 = vector.broadcast %265 : vector<1x128xf32> to vector<4x128xf32>
    %267 = arith.mulf %264, %266 : vector<4x128xf32>
    %c9_258 = arith.constant 9 : index
    %c0_259 = arith.constant 0 : index
    %268 = vector.load %arg7[%c9_258, %c0_259] : memref<12x128xf32, #tpu.memory_space<vmem>>, vector<1x128xf32>
    %269 = vector.broadcast %268 : vector<1x128xf32> to vector<4x128xf32>
    %270 = arith.addf %267, %269 : vector<4x128xf32>
    %cst_260 = arith.constant 0.000000e+00 : f32
    %271 = vector.broadcast %cst_260 : f32 to vector<4x128xf32>
    %272 = arith.maximumf %270, %271 : vector<4x128xf32>
    %cst_261 = arith.constant 0.000000e+00 : f32
    %273 = vector.broadcast %cst_261 : f32 to vector<1x128xf32>
    %c7_262 = arith.constant 7 : index
    %c0_263 = arith.constant 0 : index
    %274 = vector.load %arg13[%c7_262, %c0_263] : memref<20x128xf32, #tpu.memory_space<vmem>>, vector<1x128xf32>
    tpu.vector_store %arg13[%c7_262, %c0_263], %273 {strides = array<i32>} : memref<20x128xf32, #tpu.memory_space<vmem>>, vector<1x128xf32>,
    %c8_264 = arith.constant 8 : index
    %c0_265 = arith.constant 0 : index
    %275 = vector.load %arg13[%c8_264, %c0_265] : memref<20x128xf32, #tpu.memory_space<vmem>>, vector<4x128xf32>
    tpu.vector_store %arg13[%c8_264, %c0_265], %272 {strides = array<i32>} : memref<20x128xf32, #tpu.memory_space<vmem>>, vector<4x128xf32>,
    %c12_266 = arith.constant 12 : index
    %c0_267 = arith.constant 0 : index
    %276 = vector.load %arg13[%c12_266, %c0_267] : memref<20x128xf32, #tpu.memory_space<vmem>>, vector<1x128xf32>
    tpu.vector_store %arg13[%c12_266, %c0_267], %273 {strides = array<i32>} : memref<20x128xf32, #tpu.memory_space<vmem>>, vector<1x128xf32>,
    %c8_268 = arith.constant 8 : index
    %c0_269 = arith.constant 0 : index
    %277 = vector.load %arg12[%c8_268, %c0_269] : memref<20x128xf32, #tpu.memory_space<vmem>>, vector<4x128xf32>
    %cst_270 = arith.constant 0.000000e+00 : f32
    %278 = vector.broadcast %cst_270 : f32 to vector<4x128xf32>
    %c7_271 = arith.constant 7 : index
    %c0_272 = arith.constant 0 : index
    %279 = vector.load %arg13[%c7_271, %c0_272] : memref<20x128xf32, #tpu.memory_space<vmem>>, vector<4x128xf32>
    %280 = arith.truncf %279 : vector<4x128xf32> to vector<4x128xbf16>
    %c7_273 = arith.constant 7 : index
    %c0_274 = arith.constant 0 : index
    %c0_275 = arith.constant 0 : index
    %c0_276 = arith.constant 0 : index
    %281 = vector.load %arg3[%c7_273, %c0_274, %c0_275, %c0_276] : memref<8x3x128x128xbf16, #tpu.memory_space<vmem>>, vector<1x1x128x128xbf16>
    %282 = vector.shape_cast %281 : vector<1x1x128x128xbf16> to vector<128x128xbf16>
    %cst_277 = arith.constant dense<0.000000e+00> : vector<4x128xf32>
    %283 = tpu.matmul %280, %282, %cst_277 {dimension_numbers = #tpu.dot_dimension_numbers<[1], [0], [0], [1], [0, 0, 1, 1], [], []>} : vector<4x128xbf16>, vector<128x128xbf16>, vector<4x128xf32> -> vector<4x128xf32>
    %284 = arith.addf %278, %283 : vector<4x128xf32>
    %c8_278 = arith.constant 8 : index
    %c0_279 = arith.constant 0 : index
    %285 = vector.load %arg13[%c8_278, %c0_279] : memref<20x128xf32, #tpu.memory_space<vmem>>, vector<4x128xf32>
    %286 = arith.truncf %285 : vector<4x128xf32> to vector<4x128xbf16>
    %c7_280 = arith.constant 7 : index
    %c1_281 = arith.constant 1 : index
    %c0_282 = arith.constant 0 : index
    %c0_283 = arith.constant 0 : index
    %287 = vector.load %arg3[%c7_280, %c1_281, %c0_282, %c0_283] : memref<8x3x128x128xbf16, #tpu.memory_space<vmem>>, vector<1x1x128x128xbf16>
    %288 = vector.shape_cast %287 : vector<1x1x128x128xbf16> to vector<128x128xbf16>
    %cst_284 = arith.constant dense<0.000000e+00> : vector<4x128xf32>
    %289 = tpu.matmul %286, %288, %cst_284 {dimension_numbers = #tpu.dot_dimension_numbers<[1], [0], [0], [1], [0, 0, 1, 1], [], []>} : vector<4x128xbf16>, vector<128x128xbf16>, vector<4x128xf32> -> vector<4x128xf32>
    %290 = arith.addf %284, %289 : vector<4x128xf32>
    %c9_285 = arith.constant 9 : index
    %c0_286 = arith.constant 0 : index
    %291 = vector.load %arg13[%c9_285, %c0_286] : memref<20x128xf32, #tpu.memory_space<vmem>>, vector<4x128xf32>
    %292 = arith.truncf %291 : vector<4x128xf32> to vector<4x128xbf16>
    %c7_287 = arith.constant 7 : index
    %c2_288 = arith.constant 2 : index
    %c0_289 = arith.constant 0 : index
    %c0_290 = arith.constant 0 : index
    %293 = vector.load %arg3[%c7_287, %c2_288, %c0_289, %c0_290] : memref<8x3x128x128xbf16, #tpu.memory_space<vmem>>, vector<1x1x128x128xbf16>
    %294 = vector.shape_cast %293 : vector<1x1x128x128xbf16> to vector<128x128xbf16>
    %cst_291 = arith.constant dense<0.000000e+00> : vector<4x128xf32>
    %295 = tpu.matmul %292, %294, %cst_291 {dimension_numbers = #tpu.dot_dimension_numbers<[1], [0], [0], [1], [0, 0, 1, 1], [], []>} : vector<4x128xbf16>, vector<128x128xbf16>, vector<4x128xf32> -> vector<4x128xf32>
    %296 = arith.addf %290, %295 : vector<4x128xf32>
    %c10 = arith.constant 10 : index
    %c0_292 = arith.constant 0 : index
    %297 = vector.load %arg6[%c10, %c0_292] : memref<12x128xf32, #tpu.memory_space<vmem>>, vector<1x128xf32>
    %298 = vector.broadcast %297 : vector<1x128xf32> to vector<4x128xf32>
    %299 = arith.mulf %296, %298 : vector<4x128xf32>
    %c10_293 = arith.constant 10 : index
    %c0_294 = arith.constant 0 : index
    %300 = vector.load %arg7[%c10_293, %c0_294] : memref<12x128xf32, #tpu.memory_space<vmem>>, vector<1x128xf32>
    %301 = vector.broadcast %300 : vector<1x128xf32> to vector<4x128xf32>
    %302 = arith.addf %299, %301 : vector<4x128xf32>
    %303 = arith.addf %302, %277 : vector<4x128xf32>
    %cst_295 = arith.constant 0.000000e+00 : f32
    %304 = vector.broadcast %cst_295 : f32 to vector<4x128xf32>
    %305 = arith.maximumf %303, %304 : vector<4x128xf32>
    %cst_296 = arith.constant dense<0.000000e+00> : vector<128xf32>
    %306 = vector.multi_reduction <add>, %305, %cst_296 [0] : vector<4x128xf32> to vector<128xf32>
    %307 = vector.shape_cast %306 : vector<128xf32> to vector<1x128xf32>
    %cst_297 = arith.constant 4.000000e+00 : f32
    %308 = vector.broadcast %cst_297 : f32 to vector<1x128xf32>
    %309 = arith.divf %307, %308 : vector<1x128xf32>
    %310 = arith.truncf %309 : vector<1x128xf32> to vector<1x128xbf16>
    %c0_298 = arith.constant 0 : index
    %c0_299 = arith.constant 0 : index
    %311 = vector.load %arg5[%c0_298, %c0_299] : memref<128x128xbf16, #tpu.memory_space<vmem>>, vector<128x128xbf16>
    %cst_300 = arith.constant dense<0.000000e+00> : vector<1x128xf32>
    %312 = tpu.matmul %310, %311, %cst_300 {dimension_numbers = #tpu.dot_dimension_numbers<[1], [0], [0], [1], [0, 0, 1, 1], [], []>} : vector<1x128xbf16>, vector<128x128xbf16>, vector<1x128xf32> -> vector<1x128xf32>
    %c11 = arith.constant 11 : index
    %c0_301 = arith.constant 0 : index
    %313 = vector.load %arg7[%c11, %c0_301] : memref<12x128xf32, #tpu.memory_space<vmem>>, vector<1x128xf32>
    %314 = arith.addf %312, %313 : vector<1x128xf32>
    %c0_302 = arith.constant 0 : index
    %c0_303 = arith.constant 0 : index
    %c0_304 = arith.constant 0 : index
    %315 = vector.load %arg8[%c0_302, %c0_303, %c0_304] : memref<1x1x128xf32, #tpu.memory_space<vmem>>, vector<1x1x128xf32>
    %316 = vector.shape_cast %315 : vector<1x1x128xf32> to vector<1x128xf32>
    %317 = vector.shape_cast %314 : vector<1x128xf32> to vector<1x1x128xf32>
    tpu.vector_store %arg8[%c0_302, %c0_303, %c0_304], %317 {strides = array<i32>} : memref<1x1x128xf32, #tpu.memory_space<vmem>>, vector<1x1x128xf32>,
    return
  }
  func.func @transform_0(%arg0: i32) -> (i32, i32, i32) {
    %c0_i32 = arith.constant 0 : i32
    %c0_i32_0 = arith.constant 0 : i32
    %c0_i32_1 = arith.constant 0 : i32
    return %arg0, %c0_i32, %c0_i32_0 : i32, i32, i32
  }
  func.func @transform_1(%arg0: i32) -> (i32, i32) {
    %c0_i32 = arith.constant 0 : i32
    %c0_i32_0 = arith.constant 0 : i32
    %c0_i32_1 = arith.constant 0 : i32
    return %c0_i32, %c0_i32_0 : i32, i32
  }
  func.func @transform_2(%arg0: i32) -> (i32, i32, i32, i32) {
    %c0_i32 = arith.constant 0 : i32
    %c0_i32_0 = arith.constant 0 : i32
    %c0_i32_1 = arith.constant 0 : i32
    %c0_i32_2 = arith.constant 0 : i32
    %c0_i32_3 = arith.constant 0 : i32
    return %c0_i32, %c0_i32_0, %c0_i32_1, %c0_i32_2 : i32, i32, i32, i32
  }
  func.func @transform_3(%arg0: i32) -> (i32, i32, i32) {
    %c0_i32 = arith.constant 0 : i32
    %c0_i32_0 = arith.constant 0 : i32
    %c0_i32_1 = arith.constant 0 : i32
    %c0_i32_2 = arith.constant 0 : i32
    return %c0_i32, %c0_i32_0, %c0_i32_1 : i32, i32, i32
  }
  func.func @transform_4(%arg0: i32) -> (i32, i32) {
    %c0_i32 = arith.constant 0 : i32
    %c0_i32_0 = arith.constant 0 : i32
    %c0_i32_1 = arith.constant 0 : i32
    return %c0_i32, %c0_i32_0 : i32, i32
  }
  func.func @transform_5(%arg0: i32) -> (i32, i32) {
    %c0_i32 = arith.constant 0 : i32
    %c0_i32_0 = arith.constant 0 : i32
    %c0_i32_1 = arith.constant 0 : i32
    return %c0_i32, %c0_i32_0 : i32, i32
  }
  func.func @transform_6(%arg0: i32) -> (i32, i32) {
    %c0_i32 = arith.constant 0 : i32
    %c0_i32_0 = arith.constant 0 : i32
    %c0_i32_1 = arith.constant 0 : i32
    return %c0_i32, %c0_i32_0 : i32, i32
  }
  func.func @transform_7(%arg0: i32) -> (i32, i32, i32) {
    %c0_i32 = arith.constant 0 : i32
    %c0_i32_0 = arith.constant 0 : i32
    %c0_i32_1 = arith.constant 0 : i32
    return %arg0, %c0_i32, %c0_i32_0 : i32, i32, i32
  }
}

</mosaic_0001>

<bundles_post_ra>
// kernel: rsnet_forward.1
= control target key start
LH: loop header
LB: loop body
LE: loop exit
PB: predicated region body
PF: predicated region fallthrough
CT: control target
= control target key end

     0   :  { %12 = vsyncpa [#allocation8], 0  ;;  %s5584_s0 = inlined_call_operand.vmem [shape: f32[2,16,8], index: 0, kind: input, shape index: {}]   ;;  %s5585_s1 = inlined_call_operand.vmem [shape: f32[3,128], index: 1, kind: input, shape index: {}]   ;;  %s5586_s2 = inlined_call_operand.hbm [shape: bf16[8,3,128,128], index: 2, kind: input, shape index: {}]   ;;  %s5587_s3 = inlined_call_operand.hbm [shape: bf16[2,128,128], index: 3, kind: input, shape index: {}]   ;;  %s5588_s4 = inlined_call_operand.vmem [shape: bf16[128,128], index: 4, kind: input, shape index: {}]   ;;  %s5589_s5 = inlined_call_operand.vmem [shape: f32[12,128], index: 5, kind: input, shape index: {}]   ;;  %s5590_s6 = inlined_call_operand.vmem [shape: f32[12,128], index: 6, kind: input, shape index: {}]   ;;  %s5591_s7 = inlined_call_operand.hbm [shape: f32[2,1,128], index: 7, kind: output, shape index: {}]  }
   0x1   :  { %13 = vsyncpa [#allocation11], 0 }
   0x2   :  { %14 = vsyncpa [#allocation9], 0 }
   0x3   :  { %16 = vsyncpa [#allocation9 + $0x1], 0  ;;  %s5041_s24 = smov 0   ;;  %s5043_s25 = smov 0  }
   0x4   :  { %s5045_s26 = smov 0   ;;  %s5047_s27 = smov 0  }
   0x5 LB: > { %s5062_s28 = sadd.s32 4294967295, %s4991_s27   ;;  %s3550_s29 = sadd.s32 4294967294, %s4991_s27   ;;  %s4991_s27 = sphi %s5047_s27, %s5605_s27   ;;  %s4987_s26 = sphi %s5045_s26, %s5604_s26   ;;  %s4983_s25 = sphi %s5043_s25, %s5603_s25   ;;  %s4979_s24 = sphi %s5041_s24, %s5602_s24  }
   0x6   : > { %s5066_s30 = sadd.s32 1, %s4991_s27   ;;  %s181_s8 = sadd.s32 1, %s4987_s26 }
   0x7   : > { %s178_s9 = ssub.s32 %s4991_s27, %s5066_s30  ;;  %p191_p0 = scmp.ne.s32.totalorder %s4987_s26, %s4983_s25 }
   0x8   : > { %p179_p1 = scmp.eq.s32.totalorder %s178_s9, 0  ;;  %p192_p2 = scmp.eq.s32.totalorder %s5062_s28, 1 }
   0x9   : > { %p197_p3 = scmp.ne.s32.totalorder %s4983_s25, %s4979_s24  ;;  %p198_p4 = scmp.eq.s32.totalorder %s3550_s29, 1 }
   0xa   : > { %s5077_s10 = scalar_select %p179_p1, %s4987_s26, %s181_s8  }
   0xb   : > { %p5079_p5 = por %p192_p2, %p191_p0  ;;  %p5083_p6 = por %p198_p4, %p197_p3 }
   0xc   : > { %p3551_p7 = scmp.ge.s32.totalorder %s4991_s27, 1  ;;  %p205_p8 = scmp.lt.s32.totalorder %s4991_s27, 3 }
   0xd   : > { %s5594_s12 = scalar_select %p5083_p6, 1, 0 }
   0xe   : > { %p5592_p9 = scmp.eq.s32.totalorder %s5062_s28, 0  ;;  %p5090_p10 = pnand %p3551_p7, %p205_p8 }
   0xf   : > { %s4993_s14 = smov [#allocation7]   ;;  %s4994_s17 = smov [#allocation10]  }
  0x10   : > { %s220_s15 = sshll.u32 %s4993_s14, 4  ;;  %p4598_p11 = pneg %p5090_p10  ;;  %s221_s15 = int_to_ptr.vmem [resolvable:$true] %s220_s15 }
  0x11   : > { %s233_s18 = sshll.u32 %s4994_s17, 4  ;;  %s4882_s19 = scalar_lea.vmem %s221_s15, 24576  ;;  %s234_s18 = int_to_ptr.vmem [resolvable:$true] %s233_s18 }
  0x12   : > { %p5098_p12 = pnand %p5592_p9, %p4598_p11  ;;  %p4883_p0 = scmp.ne.s32.totalorder %s221_s15, %s4882_s19 }
  0x13   : > { %p4890_p3 = scmp.lt.s32.totalorder %s221_s15, %s221_s15  ;;  %p4891_p4 = scmp.lt.s32.totalorder %s4882_s19, %s4882_s19 }
  0x14   : > { %p4873_p13 = pneg %p5098_p12 }
  0x15   : > { %p4892_p7 = por %p4891_p4, %p4890_p3 }
  0x16   : > { %p4885_p1 = pnand %p4883_p0, %p4873_p13 }
  0x18   : > { %p4886_p2 = pneg %p4885_p1 }
  0x1a   : > { %p4893_p8 = pnand %p4892_p7, %p4886_p2 }
  0x1c   : > { %4896 = shalt.err (!%p4893_p8)
}
  0x1d   : > { %s4995_s20 = smov 64   ;;  %s4996_s21 = smov 4  }
  0x1e   : > { %4601 = dma.hbm_to_vmem [thread:$0]  (!%p5098_p12), %s5586_s2, 24576, %s221_s15, [#allocation8], %s4995_s20, %s4995_s20, %s4996_s21  }
  0x1f   : > { %s4908_s29 = scalar_lea.vmem %s234_s18, 2048  ;;  %p4916_p9 = scmp.lt.s32.totalorder %s234_s18, %s234_s18 }
  0x20   : > { %p4909_p11 = scmp.ne.s32.totalorder %s234_s18, %s4908_s29  ;;  %p4917_p6 = scmp.lt.s32.totalorder %s4908_s29, %s4908_s29 }
  0x22   : > { %p4911_p0 = pnand %p4909_p11, %p4873_p13  ;;  %p4918_p3 = por %p4917_p6, %p4916_p9 }
  0x24   : > { %p4912_p1 = pneg %p4911_p0 }
  0x26   : > { %p4919_p2 = pnand %p4918_p3, %p4912_p1 }
  0x28   : > { %4922 = shalt.err (!%p4919_p2)
}
  0x29   : > { %4604 = dma.hbm_to_vmem [thread:$0]  (!%p5098_p12), %s5587_s3, 2048, %s234_s18, [#allocation11], %s4995_s20, %s4995_s20, %s4996_s21  }
  0x2a   : > { %266 = sbr.rel (%p5090_p10) target bundleno = 2357 (0x935), region = 48  ;;  %p5597_p4 = scmp.eq.s32.totalorder (!%p5090_p10), %s5062_s28, 0 }
  0x2f   : > { %4966 = dma.done.wait (%p5597_p4), [#allocation8], 24576   ;;  %p5598_p13 = pmov %p5597_p4 }
  0x30   : > { %p5599_p7 = pmov %p5597_p4 }
  0x31   : > { %4968 = vsyncadd (%p5598_p13), [#allocation8], 4294942720 }
  0x32   : > { %4970 = dma.done.wait (%p5599_p7), [#allocation11], 2048   ;;  %p5600_p6 = pmov %p5597_p4 }
  0x33   : > { %p301_p9 = scmp.lt.s32.totalorder %s5062_s28, 1  ;;  %v4997_v0 = vmov 0.0   ;;  %v4998_v1 = vmov 0   ;;  %vm311_vm0 = vcmask 1040384   ;;  %v4655_v7 = vld [vmem:[#allocation7 + $0x78] sm:$0xff]   ;;  %vm317_vm1 = vcmask 1046528  }
  0x34   : > { %4972 = vsyncadd (%p5600_p6), [#allocation11], 4294965248  ;;  %390 = vst [vmem:[#allocation2 + $0x7] sm:$0x1] %v4997_v0  ;;  %4653 = vset.pattern.permute.xlu1 %v4998_v1  ;;  %4654 = vset.pattern.permute.xlu0 %v4998_v1  ;;  %v4656_v9 = vld [vmem:[#allocation7 + $0x38] sm:$0xff]   ;;  %v4657_v10 = vld [vmem:[#allocation7 + $0x70] sm:$0xff]  }
  0x35   : > { %731 = vst [vmem:[#allocation4 + $0x7] sm:$0x1] %v4997_v0  ;;  %733 = vst [vmem:[#allocation4 + $0x10] sm:$0x1] %v4997_v0  ;;  %s302_s13 = scalar_select %p301_p9, %s5062_s28, 1  ;;  %4048 = vmatprep.subr.bf16.mxu0 %v4997_v0  ;;  %4068 = vmatprep.subr.bf16.mxu1 %v4997_v0  ;;  %v4658_v13 = vld [vmem:[#allocation7 + $0x30] sm:$0xff]  }
  0x36   : > { %1188 = vst [vmem:[#allocation3 + $0x7] sm:$0x1] %v4997_v0  ;;  %1190 = vst [vmem:[#allocation3 + $0x10] sm:$0x1] %v4997_v0  ;;  %4049 = vmatpush3.bf16.msra.mxu0 %v4655_v7  ;;  %4069 = vmatpush3.bf16.msra.mxu1 %v4656_v9  ;;  %v4659_v15 = vld [vmem:[#allocation7 + $0x68] sm:$0xff]   ;;  %v4661_v18 = vld [vmem:[#allocation7 + $0x60] sm:$0xff]  }
  0x37   : > { %2207 = vst [vmem:[#allocation6 + $0x7] sm:$0x1] %v4997_v0  ;;  %2209 = vst [vmem:[#allocation6 + $0xc] sm:$0x1] %v4997_v0  ;;  %s3804_s14 = sshll.u32 %s302_s13, 4  ;;  %4050 = vmatprep.subr.bf16.mxu0 %v4997_v0  ;;  %4070 = vmatprep.subr.bf16.mxu1 %v4997_v0  ;;  %v4660_v17 = vld [vmem:[#allocation7 + $0x28] sm:$0xff]  }
  0x38   : > { %2665 = vst [vmem:[#allocation5 + $0x7] sm:$0x1] %v4997_v0  ;;  %2667 = vst [vmem:[#allocation5 + $0xc] sm:$0x1] %v4997_v0  ;;  %s305_s17 = scalar_lea.vmem %s5584_s0, %s3804_s14  ;;  %v4662_v19 = vld [vmem:[#allocation7 + $0x20] sm:$0xff]   ;;  %v4663_v20 = vld [vmem:[#allocation7 + $0x58] sm:$0xff]  }
  0x39   : > { %v307_v2 = vld [vmem:[%s305_s17] sm:$0xff]  ;;  %v308_v3 = vld [vmem:[%s305_s17 + $0x8] sm:$0xff]  ;;  %v4664_v21 = vld [vmem:[#allocation7 + $0x18] sm:$0xff]   ;;  %vm4999_vm2 = vmmov 0   ;;  %vm3343_vm3 = vcmask 1043456   ;;  %s299_s14 = sand.u32 1, %s4983_s25  }
  0x3a   : > { %341 = vperm.xlu1 %4653, %v307_v2   ;;  %v312_v4 = vrot.slane %v307_v2, 7  ;;  %v313_v5 = vrot.slane %v308_v3, 7  ;;  %v319_v6 = vrot.slane %v308_v3, 1  ;;  %v318_v11 = vrot.slane %v307_v2, 1  ;;  %4051 = vmatpush3.bf16.msra.mxu0 %v4657_v10  ;;  %v4665_v22 = vld [vmem:[#allocation7 + $0x50] sm:$0xff]   ;;  %v4667_v24 = vld [vmem:[#allocation7 + $0x48] sm:$0xff]  }
  0x3b   : > { %4071 = vmatpush3.bf16.msra.mxu1 %v4658_v13  ;;  %4052 = vmatprep.subr.bf16.mxu0 %v4997_v0  ;;  %v4666_v23 = vld [vmem:[#allocation7 + $0x10] sm:$0xff]   ;;  %v4668_v25 = vld [vmem:[#allocation7 + $0x8] sm:$0xff]   ;;  %v4669_v26 = vld [vmem:[#allocation7 + $0x40] sm:$0xff]   ;;  %s3801_s17 = sshll.u32 %s5062_s28, 4  ;;  %s300_s18 = scalar_lea.vmem [#allocation12], %s299_s14 }
  0x3c   : > { %v316_v8 = vsel %vm311_vm0, 0.0, %v312_v4  ;;  %v314_v12 = vsel %vm311_vm0, %v312_v4, %v313_v5  ;;  %v322_v14 = vsel %vm317_vm1, %v319_v6, 0.0  ;;  %v320_v16 = vsel %vm317_vm1, %v318_v11, %v319_v6  ;;  %4072 = vmatprep.subr.bf16.mxu1 %v4997_v0  ;;  %4064 = vmatprep.mubr.msk.bf16.mxu0 %vm4999_vm2, %v4997_v0  ;;  %v4670_v27 = vld [vmem:[#allocation7] sm:$0xff]   ;;  %v4671_v55 = vld [vmem:[#allocation7 + $0xb8] sm:$0xff]   ;;  %v4673_v61 = vld [vmem:[#allocation7 + $0xb0] sm:$0xff]   ;;  %s3473_s19 = sshll.u32 %s300_s18, 4  ;;  %s5543_s22 = scalar_lea.hbm %s5591_s7, %s3801_s17  ;;  %s5545_s19 = int_to_ptr.vmem [resolvable:$true] %s3473_s19 }
  0x3d   : > { %326 = vperm.xlu0 %4654, %v316_v8   ;;  %4084 = vmatprep.mubr.msk.bf16.mxu1 %vm4999_vm2, %v4997_v0  ;;  %v3561_v29 = vld [vmem:[%s5585_s1 + $0x1] ss:$0 sm:$0xff]  ;;  %v3560_v30 = vld [vmem:[%s5585_s1] ss:$0 sm:$0xff]  ;;  %v3562_v33 = vld [vmem:[%s5585_s1 + $0x2] ss:$0 sm:$0xff] }
  0x3e   : > { %345 = vperm.xlu1 %4653, %v308_v3   ;;  %4053 = vmatpush3.bf16.msra.mxu0 %v4659_v15  ;;  %v3563_v40 = vld [vmem:[%s5589_s5] ss:$0 sm:$0xff]  ;;  %v4672_v58 = vld [vmem:[#allocation10 + $0x38] sm:$0xff]   ;;  %v4674_v62 = vld [vmem:[#allocation10 + $0x30] sm:$0xff]   ;;  %s3461_s23 = scalar_lea.sflag [#allocation9], %s299_s14  ;;  %s4923_s29 = scalar_lea.vmem %s5545_s19, 16 }
  0x3f   : > { %4073 = vmatpush3.bf16.msra.mxu1 %v4660_v17  ;;  %4054 = vmatprep.subr.bf16.mxu0 %v4997_v0  ;;  %v3564_v43 = vld [vmem:[%s5590_s6] ss:$0 sm:$0xff]  ;;  %v4675_v63 = vld [vmem:[#allocation7 + $0xa8] sm:$0xff]   ;;  %v4679_v4 = vld [vmem:[#allocation7 + $0x98] sm:$0xff]   ;;  %p4924_p10 = scmp.ne.s32.totalorder %s5545_s19, %s4923_s29  ;;  %s5000_s28 = smov [#allocation12]  }
  0x40   : > { %4074 = vmatprep.subr.bf16.mxu1 %v4997_v0  ;;  %v4676_v1 = vld [vmem:[#allocation10 + $0x28] sm:$0xff]   ;;  %v4677_v2 = vld [vmem:[#allocation7 + $0xa0] sm:$0xff]   ;;  %v4680_v5 = vld [vmem:[#allocation10 + $0x18] sm:$0xff]   ;;  %s4927_s8 = sshll.u32 %s5000_s28, 4  ;;  %s4928_s8 = int_to_ptr.vmem [resolvable:$false] %s4927_s8 }
  0x41   : > { %330 = vperm.xlu0 %4654, %v314_v12   ;;  %v4678_v3 = vld [vmem:[#allocation10 + $0x20] sm:$0xff]   ;;  %v4681_v6 = vld [vmem:[#allocation7 + $0x90] sm:$0xff]   ;;  %v4683_v8 = vld [vmem:[#allocation7 + $0x88] sm:$0xff]   ;;  %p4925_p12 = pnand %p4924_p10, %p5079_p5  ;;  %s4929_s9 = scalar_lea.vmem %s4928_s8, 32 }
  0x42   : > { %363 = vperm.xlu1 %4653, %v322_v14   ;;  %4055 = vmatpush3.bf16.msra.mxu0 %v4661_v18  ;;  %v4682_v7 = vld [vmem:[#allocation10 + $0x10] sm:$0xff]   ;;  %v4684_v9 = vld [vmem:[#allocation10 + $0x8] sm:$0xff]   ;;  %v4685_v10 = vld [vmem:[#allocation7 + $0x80] sm:$0xff]   ;;  %p4930_p11 = scmp.lt.s32.totalorder %s5545_s19, %s4928_s8  ;;  %p4931_p0 = scmp.lt.s32.totalorder %s4929_s9, %s4923_s29 }
  0x43   : > { %4075 = vmatpush3.bf16.msra.mxu1 %v4662_v19  ;;  %4056 = vmatprep.subr.bf16.mxu0 %v4997_v0  ;;  %v4686_v11 = vld [vmem:[#allocation10] sm:$0xff]   ;;  %v4688_v17 = vld [vmem:[#allocation7 + $0xf8] sm:$0xff]   ;;  %v4689_v18 = vld [vmem:[#allocation7 + $0x130] sm:$0xff]   ;;  %p4926_p8 = pneg %p4925_p12 }
  0x44   : > { %4076 = vmatprep.subr.bf16.mxu1 %v4997_v0  ;;  %v4690_v19 = vld [vmem:[#allocation7 + $0xf0] sm:$0xff]   ;;  %p4932_p1 = por %p4931_p0, %p4930_p11 }
  0x45   : > { %358 = vperm.xlu0 %4654, %v320_v16   ;;  %v4687_v16 = vld [vmem:[#allocation7 + $0x138] sm:$0xff]  }
  0x46   : > { %4057 = vmatpush3.bf16.msra.mxu0 %v4663_v20  ;;  %v4691_v20 = vld [vmem:[#allocation7 + $0x128] sm:$0xff]   ;;  %p4933_p3 = pnand %p4932_p1, %p4926_p8 }
  0x47   : > { %4077 = vmatpush3.bf16.msra.mxu1 %v4664_v21  ;;  %4058 = vmatprep.subr.bf16.mxu0 %v4997_v0  ;;  %v4692_v21 = vld [vmem:[#allocation7 + $0xe8] sm:$0xff]  }
  0x48   : > { %4078 = vmatprep.subr.bf16.mxu1 %v4997_v0 }
  0x4a   : > { %4059 = vmatpush3.bf16.msra.mxu0 %v4665_v22  ;;  %v4693_v22 = vld [vmem:[#allocation7 + $0x120] sm:$0xff]  }
  0x4b   : > { %4079 = vmatpush3.bf16.msra.mxu1 %v4666_v23  ;;  %4060 = vmatprep.subr.bf16.mxu0 %v4997_v0  ;;  %v4695_v23 = vld [vmem:[#allocation7 + $0x118] sm:$0xff]  }
  0x4c   : > { %4080 = vmatprep.subr.bf16.mxu1 %v4997_v0 }
  0x4e   : > { %4061 = vmatpush3.bf16.msra.mxu0 %v4667_v24  ;;  %v4697_v24 = vld [vmem:[#allocation7 + $0x110] sm:$0xff]  }
  0x4f   : > { %4081 = vmatpush3.bf16.msra.mxu1 %v4668_v25  ;;  %4062 = vmatprep.subr.bf16.mxu0 %v4997_v0  ;;  %v4694_v25 = vld [vmem:[#allocation7 + $0xe0] sm:$0xff]  }
  0x50   : > { %4082 = vmatprep.subr.bf16.mxu1 %v4997_v0 }
  0x52   : > { %4063 = vmatpush3.bf16.msra.mxu0 %v4669_v26  ;;  %v4699_v26 = vld [vmem:[#allocation7 + $0x108] sm:$0xff]  }
  0x53   : > { %4083 = vmatpush3.bf16.msra.mxu1 %v4670_v27  ;;  %4088 = vmatprep.subr.bf16.mxu0 %v4997_v0  ;;  %v4696_v27 = vld [vmem:[#allocation7 + $0xd8] sm:$0xff]  }
  0x54   : > { %4108 = vmatprep.subr.bf16.mxu1 %v4997_v0 }
  0xb5   : > { %v342_v28 = vpop.permute.xlu1 %341 }
  0xb6   : > { %v352_v35 = vmul.f32 %v3561_v29, %v342_v28  ;;  %v4701_v28 = vld [vmem:[#allocation7 + $0x100] sm:$0xff]  }
  0xb8   : > { %v327_v31 = vpop.permute.xlu0 %326 }
  0xb9   : > { %v346_v32 = vpop.permute.xlu1 %345  ;;  %v337_v36 = vmul.f32 %v3560_v30, %v327_v31  ;;  %v4702_v31 = vld [vmem:[#allocation7 + $0xc0] sm:$0xff]  }
  0xba   : > { %v353_v37 = vmul.f32 %v3561_v29, %v346_v32  ;;  %v4698_v29 = vld [vmem:[#allocation7 + $0xd0] sm:$0xff]  }
  0xbb   : > { %v354_v45 = vadd.f32 %v352_v35, %v337_v36 }
  0xbc   : > { %v331_v34 = vpop.permute.xlu0 %330 }
  0xbd   : > { %v338_v38 = vmul.f32 %v3560_v30, %v331_v34  ;;  %v364_v39 = vpop.permute.xlu1 %363  ;;  %v4700_v30 = vld [vmem:[#allocation7 + $0xc8] sm:$0xff]  }
  0xbe   : > { %v371_v41 = vmul.f32 %v3562_v33, %v364_v39 }
  0xbf   : > { %v355_v42 = vadd.f32 %v353_v37, %v338_v38 }
  0xc0   : > { %v359_v44 = vpop.permute.xlu0 %358 }
  0xc1   : > { %v373_v46 = vadd.f32 %v371_v41, %v355_v42  ;;  %v370_v47 = vmul.f32 %v3562_v33, %v359_v44  ;;  %v3589_v42 = vld [vmem:[%s5589_s5 + $0x1] ss:$0 sm:$0xff] }
  0xc3   : > { %v380_v48 = vmul.f32 %v3563_v40, %v373_v46  ;;  %v372_v49 = vadd.f32 %v370_v47, %v354_v45  ;;  %v3590_v45 = vld [vmem:[%s5590_s6 + $0x1] ss:$0 sm:$0xff] }
  0xc5   : > { %v387_v50 = vadd.f32 %v3564_v43, %v380_v48  ;;  %v379_v51 = vmul.f32 %v3563_v40, %v372_v49 }
  0xc7   : > { %v389_v52 = vmax.f32 %v387_v50, 0.0  ;;  %v386_v53 = vadd.f32 %v3564_v43, %v379_v51 }
  0xc9   : > { %392 = vst [vmem:[#allocation2 + $0x10] sm:$0xff] %v389_v52  ;;  %v388_v54 = vmax.f32 %v386_v53, 0.0 }
  0xcb   : > { %391 = vst [vmem:[#allocation2 + $0x8] sm:$0xff] %v388_v54 }
  0xd2   : > { %v414_v56 = vld [vmem:[#allocation2 + $0x8] ss:$2 sm:$0xff]  ;;  %v395_v57 = vld [vmem:[#allocation2 + $0x7] ss:$2 sm:$0xff] }
  0xd3   : > { %v415_v59 = vpack.c.bf16 %v414_v56, %v414_v56  ;;  %v396_v60 = vpack.c.bf16 %v395_v57, %v395_v57  ;;  %v610_v12 = vld [vmem:[#allocation2 + $0x9] ss:$2 sm:$0xff]  ;;  %v734_v13 = vld [vmem:[#allocation2 + $0x8] ss:$2 sm:$0xff] }
  0xd4   : > { %v611_v14 = vpack.c.bf16 %v610_v12, %v610_v12  ;;  %v735_v15 = vpack.c.bf16 %v734_v13, %v734_v13  ;;  %v4704_v57 = vld [vmem:[#allocation7 + $0x170] sm:$0xff]   ;;  %v4719_v12 = vld [vmem:[#allocation7 + $0x1d8] sm:$0xff]  }
  0xd5   : > { %4065 = vmatmul.mubr.bf16.vlgmr.msra.gmra.mxu0 %v415_v59  ;;  %4085 = vmatmul.mubr.bf16.vlgmr.msra.gmra.mxu1 %v396_v60  ;;  %v4705_v59 = vld [vmem:[#allocation7 + $0x168] sm:$0xff]   ;;  %v4721_v13 = vld [vmem:[#allocation7 + $0x1d0] sm:$0xff]  }
  0xd6   : > { %4089 = vmatpush3.bf16.msra.mxu0 %v4671_v55  ;;  %4109 = vmatpush3.bf16.msra.mxu1 %v4672_v58  ;;  %v4703_v55 = vld [vmem:[#allocation7 + $0x178] sm:$0xff]  }
  0xd7   : > { %4090 = vmatprep.subr.bf16.mxu0 %v4997_v0  ;;  %4110 = vmatprep.subr.bf16.mxu1 %v4997_v0 }
  0xd8   : > { %4104 = vmatprep.mubr.msk.bf16.mxu0 %vm4999_vm2, %v4997_v0  ;;  %4124 = vmatprep.mubr.msk.bf16.mxu1 %vm4999_vm2, %v4997_v0 }
  0xda   : > { %4091 = vmatpush3.bf16.msra.mxu0 %v4673_v61  ;;  %4111 = vmatpush3.bf16.msra.mxu1 %v4674_v62  ;;  %v4706_v62 = vld [vmem:[#allocation7 + $0x160] sm:$0xff]  }
  0xdb   : > { %4092 = vmatprep.subr.bf16.mxu0 %v4997_v0  ;;  %4112 = vmatprep.subr.bf16.mxu1 %v4997_v0 }
  0xde   : > { %4093 = vmatpush3.bf16.msra.mxu0 %v4675_v63  ;;  %4113 = vmatpush3.bf16.msra.mxu1 %v4676_v1  ;;  %v4707_v63 = vld [vmem:[#allocation7 + $0x158] sm:$0xff]   ;;  %v4708_v1 = vld [vmem:[#allocation7 + $0x150] sm:$0xff]  }
  0xdf   : > { %4094 = vmatprep.subr.bf16.mxu0 %v4997_v0  ;;  %4114 = vmatprep.subr.bf16.mxu1 %v4997_v0 }
  0xe2   : > { %4095 = vmatpush3.bf16.msra.mxu0 %v4677_v2  ;;  %4115 = vmatpush3.bf16.msra.mxu1 %v4678_v3  ;;  %v4709_v2 = vld [vmem:[#allocation7 + $0x148] sm:$0xff]   ;;  %v4710_v3 = vld [vmem:[#allocation7 + $0x140] sm:$0xff]  }
  0xe3   : > { %4096 = vmatprep.subr.bf16.mxu0 %v4997_v0  ;;  %4116 = vmatprep.subr.bf16.mxu1 %v4997_v0 }
  0xe6   : > { %4097 = vmatpush3.bf16.msra.mxu0 %v4679_v4  ;;  %4117 = vmatpush3.bf16.msra.mxu1 %v4680_v5  ;;  %v4711_v5 = vld [vmem:[#allocation7 + $0x1f8] sm:$0xff]  }
  0xe7   : > { %4098 = vmatprep.subr.bf16.mxu0 %v4997_v0  ;;  %4118 = vmatprep.subr.bf16.mxu1 %v4997_v0 }
  0xea   : > { %4099 = vmatpush3.bf16.msra.mxu0 %v4681_v6  ;;  %4119 = vmatpush3.bf16.msra.mxu1 %v4682_v7  ;;  %v4712_v6 = vld [vmem:[#allocation7 + $0x1b8] sm:$0xff]   ;;  %v4713_v7 = vld [vmem:[#allocation7 + $0x1f0] sm:$0xff]  }
  0xeb   : > { %4100 = vmatprep.subr.bf16.mxu0 %v4997_v0  ;;  %4120 = vmatprep.subr.bf16.mxu1 %v4997_v0 }
  0xee   : > { %4101 = vmatpush3.bf16.msra.mxu0 %v4683_v8  ;;  %4121 = vmatpush3.bf16.msra.mxu1 %v4684_v9  ;;  %v4714_v8 = vld [vmem:[#allocation7 + $0x1b0] sm:$0xff]   ;;  %v4715_v9 = vld [vmem:[#allocation7 + $0x1e8] sm:$0xff]  }
  0xef   : > { %4102 = vmatprep.subr.bf16.mxu0 %v4997_v0  ;;  %4122 = vmatprep.subr.bf16.mxu1 %v4997_v0 }
  0xf2   : > { %4103 = vmatpush3.bf16.msra.mxu0 %v4685_v10  ;;  %4123 = vmatpush3.bf16.msra.mxu1 %v4686_v11  ;;  %v4716_v10 = vld [vmem:[#allocation7 + $0x1a8] sm:$0xff]   ;;  %v4717_v11 = vld [vmem:[#allocation7 + $0x1e0] sm:$0xff]  }
  0xf3   : > { %4128 = vmatprep.subr.bf16.mxu0 %v4997_v0  ;;  %4148 = vmatprep.subr.bf16.mxu1 %v4997_v0 }
  0xf5   : > { %4105 = vmatmul.mubr.bf16.vlgmr.msra.gmra.mxu0 %v611_v14  ;;  %4125 = vmatmul.mubr.bf16.vlgmr.msra.gmra.mxu1 %v735_v15  ;;  %v4718_v14 = vld [vmem:[#allocation7 + $0x1a0] sm:$0xff]   ;;  %v4723_v15 = vld [vmem:[#allocation7 + $0x1c8] sm:$0xff]  }
  0xf6   : > { %4144 = vmatprep.mubr.msk.bf16.mxu0 %vm4999_vm2, %v4997_v0  ;;  %4164 = vmatprep.mubr.msk.bf16.mxu1 %vm4999_vm2, %v4997_v0 }
  0xf7   : > { %4129 = vmatpush3.bf16.msra.mxu0 %v4687_v16  ;;  %4149 = vmatpush3.bf16.msra.mxu1 %v4688_v17  ;;  %v4720_v16 = vld [vmem:[#allocation7 + $0x198] sm:$0xff]   ;;  %v4725_v17 = vld [vmem:[#allocation7 + $0x1c0] sm:$0xff]  }
  0xf8   : > { %4130 = vmatprep.subr.bf16.mxu0 %v4997_v0  ;;  %4150 = vmatprep.subr.bf16.mxu1 %v4997_v0 }
  0xfb   : > { %4131 = vmatpush3.bf16.msra.mxu0 %v4689_v18  ;;  %4151 = vmatpush3.bf16.msra.mxu1 %v4690_v19  ;;  %v4722_v18 = vld [vmem:[#allocation7 + $0x190] sm:$0xff]   ;;  %v4724_v19 = vld [vmem:[#allocation7 + $0x188] sm:$0xff]  }
  0xfc   : > { %4132 = vmatprep.subr.bf16.mxu0 %v4997_v0  ;;  %4152 = vmatprep.subr.bf16.mxu1 %v4997_v0 }
  0xff   : > { %4133 = vmatpush3.bf16.msra.mxu0 %v4691_v20  ;;  %4153 = vmatpush3.bf16.msra.mxu1 %v4692_v21  ;;  %v4726_v20 = vld [vmem:[#allocation7 + $0x180] sm:$0xff]  }
 0x100   : > { %4134 = vmatprep.subr.bf16.mxu0 %v4997_v0  ;;  %4154 = vmatprep.subr.bf16.mxu1 %v4997_v0 }
 0x103   : > { %4135 = vmatpush3.bf16.msra.mxu0 %v4693_v22  ;;  %4155 = vmatpush3.bf16.msra.mxu1 %v4694_v25 }
 0x104   : > { %4136 = vmatprep.subr.bf16.mxu0 %v4997_v0  ;;  %4156 = vmatprep.subr.bf16.mxu1 %v4997_v0 }
 0x107   : > { %4137 = vmatpush3.bf16.msra.mxu0 %v4695_v23  ;;  %4157 = vmatpush3.bf16.msra.mxu1 %v4696_v27 }
 0x108   : > { %4138 = vmatprep.subr.bf16.mxu0 %v4997_v0  ;;  %4158 = vmatprep.subr.bf16.mxu1 %v4997_v0 }
 0x10b   : > { %4139 = vmatpush3.bf16.msra.mxu0 %v4697_v24  ;;  %4159 = vmatpush3.bf16.msra.mxu1 %v4698_v29  ;;  %v3599_v29 = vld [vmem:[%s5589_s5 + $0x3] ss:$0 sm:$0xff] }
 0x10c   : > { %4140 = vmatprep.subr.bf16.mxu0 %v4997_v0  ;;  %4160 = vmatprep.subr.bf16.mxu1 %v4997_v0 }
 0x10f   : > { %4141 = vmatpush3.bf16.msra.mxu0 %v4699_v26  ;;  %4161 = vmatpush3.bf16.msra.mxu1 %v4700_v30 }
 0x110   : > { %4142 = vmatprep.subr.bf16.mxu0 %v4997_v0  ;;  %4162 = vmatprep.subr.bf16.mxu1 %v4997_v0 }
 0x113   : > { %4143 = vmatpush3.bf16.msra.mxu0 %v4701_v28  ;;  %4163 = vmatpush3.bf16.msra.mxu1 %v4702_v31 }
 0x114   : > { %4168 = vmatprep.subr.bf16.mxu0 %v4997_v0  ;;  %4188 = vmatprep.subr.bf16.mxu1 %v4997_v0 }
 0x195   : > { %v515_v32 = vpop.f32.mrf.mxu0  ;;  %v603_v33 = vpop.f32.mrf.mxu1 }
 0x196   : > { %v604_v40 = vadd.f32 %v603_v33, %v515_v32  ;;  %v3625_v32 = vld [vmem:[%s5589_s5 + $0x2] ss:$0 sm:$0xff] }
 0x197   : > { %v4066_v34 = vpop.f32.mrf.mxu0  ;;  %v4086_v35 = vpop.f32.mrf.mxu1 }
 0x198   : > { %v3600_v35 = vld [vmem:[%s5590_s6 + $0x3] ss:$0 sm:$0xff] }
 0x199   : > { %v518_v36 = vpop.f32.mrf.mxu0  ;;  %v606_v37 = vpop.f32.mrf.mxu1 }
 0x19a   : > { %v3626_v36 = vld [vmem:[%s5590_s6 + $0x2] ss:$0 sm:$0xff] }
 0x19b   : > { %v4067_v38 = vpop.f32.mrf.mxu0  ;;  %v4087_v39 = vpop.f32.mrf.mxu1 }
 0x1b5   : > { %v711_v41 = vpop.f32.mrf.mxu0  ;;  %v5228_v43 = vpop.f32.mrf.mxu1 }
 0x1b6   : > { %v717_v44 = vadd.f32 %v711_v41, %v604_v40  ;;  %v845_v33 = vmul.f32 %v3599_v29, %v5228_v43 }
 0x1b7   : > { %v4106_v46 = vpop.f32.mrf.mxu0  ;;  %v4126_v47 = vpop.f32.mrf.mxu1 }
 0x1b8   : > { %v723_v48 = vmul.f32 %v3589_v42, %v717_v44  ;;  %v851_v40 = vadd.f32 %v3600_v35, %v845_v33  ;;  %v4727_v46 = vld [vmem:[#allocation7 + $0x238] sm:$0xff]   ;;  %v4728_v47 = vld [vmem:[#allocation7 + $0x230] sm:$0xff]  }
 0x1b9   : > { %v714_v49 = vpop.f32.mrf.mxu0  ;;  %v837_v50 = vpop.f32.mrf.mxu1 }
 0x1ba   : > { %v729_v51 = vadd.f32 %v3590_v45, %v723_v48  ;;  %v4729_v49 = vld [vmem:[#allocation7 + $0x228] sm:$0xff]  }
 0x1bb   : > { %v4107_v52 = vpop.f32.mrf.mxu0  ;;  %v4127_v53 = vpop.f32.mrf.mxu1 }
 0x1bc   : > { %v730_v54 = vmax.f32 %v729_v51, 0.0  ;;  %v4730_v52 = vld [vmem:[#allocation7 + $0x220] sm:$0xff]   ;;  %v4731_v53 = vld [vmem:[#allocation7 + $0x218] sm:$0xff]  }
 0x1be   : > { %732 = vst [vmem:[#allocation4 + $0x8] sm:$0xff] %v730_v54  ;;  %v872_v56 = vpack.c.bf16 %v730_v54, %v730_v54  ;;  %v4732_v54 = vld [vmem:[#allocation7 + $0x210] sm:$0xff]  }
 0x1c0   : > { %4145 = vmatmul.mubr.bf16.vlgmr.msra.gmra.mxu0 %v872_v56  ;;  %v4734_v56 = vld [vmem:[#allocation7 + $0x200] sm:$0xff]  }
 0x1c1   : > { %4169 = vmatpush3.bf16.msra.mxu0 %v4703_v55  ;;  %4184 = vmatprep.mubr.msk.bf16.mxu0 %vm4999_vm2, %v4997_v0  ;;  %v4733_v55 = vld [vmem:[#allocation7 + $0x208] sm:$0xff]  }
 0x1c2   : > { %4170 = vmatprep.subr.bf16.mxu0 %v4997_v0 }
 0x1c5   : > { %v852_v58 = vld [vmem:[#allocation4 + $0x7] sm:$0xff]  ;;  %4171 = vmatpush3.bf16.msra.mxu0 %v4704_v57 }
 0x1c6   : > { %v1066_v60 = vld [vmem:[#allocation4 + $0x9] sm:$0xff]  ;;  %v853_v61 = vpack.c.bf16 %v852_v58, %v852_v58  ;;  %1526 = vst [vmem:[#allocation4 + $0x7] sm:$0x1] %v4997_v0  ;;  %4172 = vmatprep.subr.bf16.mxu0 %v4997_v0  ;;  %v4735_v58 = vld [vmem:[#allocation7 + $0x2b8] sm:$0xff]  }
 0x1c7   : > { %1528 = vst [vmem:[#allocation4 + $0x10] sm:$0x1] %v4997_v0  ;;  %v1067_v4 = vpack.c.bf16 %v1066_v60, %v1066_v60  ;;  %v4736_v60 = vld [vmem:[#allocation7 + $0x278] sm:$0xff]  }
 0x1c8   : > { %4165 = vmatmul.mubr.bf16.vlgmr.msra.gmra.mxu1 %v853_v61  ;;  %v4739_v61 = vld [vmem:[#allocation7 + $0x2a8] sm:$0xff]  }
 0x1c9   : > { %4173 = vmatpush3.bf16.msra.mxu0 %v4705_v59  ;;  %4204 = vmatprep.mubr.msk.bf16.mxu1 %vm4999_vm2, %v4997_v0  ;;  %v4737_v59 = vld [vmem:[#allocation7 + $0x2b0] sm:$0xff]  }
 0x1ca   : > { %4174 = vmatprep.subr.bf16.mxu0 %v4997_v0  ;;  %4189 = vmatpush3.bf16.msra.mxu1 %v4711_v5  ;;  %v4747_v5 = vld [vmem:[#allocation7 + $0x288] sm:$0xff]  }
 0x1cb   : > { %4190 = vmatprep.subr.bf16.mxu1 %v4997_v0 }
 0x1cd   : > { %4175 = vmatpush3.bf16.msra.mxu0 %v4706_v62  ;;  %v4738_v62 = vld [vmem:[#allocation7 + $0x270] sm:$0xff]  }
 0x1ce   : > { %4176 = vmatprep.subr.bf16.mxu0 %v4997_v0  ;;  %4191 = vmatpush3.bf16.msra.mxu1 %v4713_v7  ;;  %v4749_v7 = vld [vmem:[#allocation7 + $0x280] sm:$0xff]  }
 0x1cf   : > { %4192 = vmatprep.subr.bf16.mxu1 %v4997_v0 }
 0x1d1   : > { %4177 = vmatpush3.bf16.msra.mxu0 %v4707_v63  ;;  %v4741_v63 = vld [vmem:[#allocation7 + $0x2a0] sm:$0xff]  }
 0x1d2   : > { %4178 = vmatprep.subr.bf16.mxu0 %v4997_v0  ;;  %4193 = vmatpush3.bf16.msra.mxu1 %v4715_v9  ;;  %v4748_v9 = vld [vmem:[#allocation7 + $0x248] sm:$0xff]  }
 0x1d3   : > { %4194 = vmatprep.subr.bf16.mxu1 %v4997_v0 }
 0x1d5   : > { %4179 = vmatpush3.bf16.msra.mxu0 %v4708_v1  ;;  %v4740_v1 = vld [vmem:[#allocation7 + $0x268] sm:$0xff]  }
 0x1d6   : > { %4180 = vmatprep.subr.bf16.mxu0 %v4997_v0  ;;  %4195 = vmatpush3.bf16.msra.mxu1 %v4717_v11 }
 0x1d7   : > { %4196 = vmatprep.subr.bf16.mxu1 %v4997_v0 }
 0x1d9   : > { %4181 = vmatpush3.bf16.msra.mxu0 %v4709_v2  ;;  %v4743_v2 = vld [vmem:[#allocation7 + $0x298] sm:$0xff]  }
 0x1da   : > { %4182 = vmatprep.subr.bf16.mxu0 %v4997_v0  ;;  %4197 = vmatpush3.bf16.msra.mxu1 %v4719_v12 }
 0x1db   : > { %4198 = vmatprep.subr.bf16.mxu1 %v4997_v0 }
 0x1dd   : > { %4183 = vmatpush3.bf16.msra.mxu0 %v4710_v3  ;;  %v4745_v3 = vld [vmem:[#allocation7 + $0x290] sm:$0xff]  }
 0x1de   : > { %4208 = vmatprep.subr.bf16.mxu0 %v4997_v0  ;;  %4199 = vmatpush3.bf16.msra.mxu1 %v4721_v13 }
 0x1df   : > { %4200 = vmatprep.subr.bf16.mxu1 %v4997_v0 }
 0x1e0   : > { %4185 = vmatmul.mubr.bf16.vlgmr.msra.gmra.mxu0 %v1067_v4  ;;  %v4742_v4 = vld [vmem:[#allocation7 + $0x260] sm:$0xff]  }
 0x1e1   : > { %4224 = vmatprep.mubr.msk.bf16.mxu0 %vm4999_vm2, %v4997_v0  ;;  %4209 = vmatpush3.bf16.msra.mxu0 %v4712_v6  ;;  %v4744_v6 = vld [vmem:[#allocation7 + $0x258] sm:$0xff]  }
 0x1e2   : > { %4210 = vmatprep.subr.bf16.mxu0 %v4997_v0  ;;  %4201 = vmatpush3.bf16.msra.mxu1 %v4723_v15 }
 0x1e3   : > { %4202 = vmatprep.subr.bf16.mxu1 %v4997_v0 }
 0x1e5   : > { %4211 = vmatpush3.bf16.msra.mxu0 %v4714_v8  ;;  %v4746_v8 = vld [vmem:[#allocation7 + $0x250] sm:$0xff]  }
 0x1e6   : > { %4212 = vmatprep.subr.bf16.mxu0 %v4997_v0  ;;  %4203 = vmatpush3.bf16.msra.mxu1 %v4725_v17 }
 0x1e7   : > { %4228 = vmatprep.subr.bf16.mxu1 %v4997_v0 }
 0x1e9   : > { %4213 = vmatpush3.bf16.msra.mxu0 %v4716_v10  ;;  %v4750_v10 = vld [vmem:[#allocation7 + $0x240] sm:$0xff]  }
 0x1ea   : > { %4214 = vmatprep.subr.bf16.mxu0 %v4997_v0 }
 0x1ed   : > { %4215 = vmatpush3.bf16.msra.mxu0 %v4718_v14 }
 0x1ee   : > { %4216 = vmatprep.subr.bf16.mxu0 %v4997_v0 }
 0x1f1   : > { %4217 = vmatpush3.bf16.msra.mxu0 %v4720_v16 }
 0x1f2   : > { %4218 = vmatprep.subr.bf16.mxu0 %v4997_v0 }
 0x1f5   : > { %4219 = vmatpush3.bf16.msra.mxu0 %v4722_v18 }
 0x1f6   : > { %4220 = vmatprep.subr.bf16.mxu0 %v4997_v0 }
 0x1f9   : > { %4221 = vmatpush3.bf16.msra.mxu0 %v4724_v19 }
 0x1fa   : > { %4222 = vmatprep.subr.bf16.mxu0 %v4997_v0 }
 0x1fd   : > { %4223 = vmatpush3.bf16.msra.mxu0 %v4726_v20 }
 0x1fe   : > { %4248 = vmatprep.subr.bf16.mxu0 %v4997_v0 }
 0x280   : > { %v972_v21 = vpop.f32.mrf.mxu0 }
 0x282   : > { %v4146_v22 = vpop.f32.mrf.mxu0 }
 0x284   : > { %v975_v23 = vpop.f32.mrf.mxu0 }
 0x285   : > { %v3652_v23 = vld [vmem:[%s5590_s6 + $0x4] ss:$0 sm:$0xff] }
 0x286   : > { %v4147_v24 = vpop.f32.mrf.mxu0 }
 0x288   : > { %v1060_v25 = vpop.f32.mrf.mxu1 }
 0x289   : > { %v1061_v30 = vadd.f32 %v1060_v25, %v972_v21  ;;  %v3651_v21 = vld [vmem:[%s5589_s5 + $0x4] ss:$0 sm:$0xff] }
 0x28a   : > { %v4166_v26 = vpop.f32.mrf.mxu1 }
 0x28c   : > { %v1063_v27 = vpop.f32.mrf.mxu1 }
 0x28e   : > { %v4167_v28 = vpop.f32.mrf.mxu1 }
 0x2a0   : > { %v1167_v31 = vpop.f32.mrf.mxu0 }
 0x2a1   : > { %v1173_v34 = vadd.f32 %v1167_v31, %v1061_v30  ;;  %v4751_v30 = vld [vmem:[#allocation7 + $0x2f8] sm:$0xff]  }
 0x2a2   : > { %v4186_v37 = vpop.f32.mrf.mxu0 }
 0x2a3   : > { %v1179_v38 = vmul.f32 %v3625_v32, %v1173_v34  ;;  %v4752_v32 = vld [vmem:[#allocation7 + $0x2f0] sm:$0xff]   ;;  %v4753_v34 = vld [vmem:[#allocation7 + $0x2e8] sm:$0xff]   ;;  %v4755_v37 = vld [vmem:[#allocation7 + $0x2d8] sm:$0xff]  }
 0x2a4   : > { %v1170_v39 = vpop.f32.mrf.mxu0 }
 0x2a5   : > { %v1185_v41 = vadd.f32 %v3626_v36, %v1179_v38  ;;  %v4754_v36 = vld [vmem:[#allocation7 + $0x2e0] sm:$0xff]   ;;  %v4756_v38 = vld [vmem:[#allocation7 + $0x2d0] sm:$0xff]   ;;  %v4757_v39 = vld [vmem:[#allocation7 + $0x2c8] sm:$0xff]  }
 0x2a6   : > { %v4187_v42 = vpop.f32.mrf.mxu0 }
 0x2a7   : > { %v1186_v44 = vadd.f32 %v1185_v41, %v851_v40  ;;  %v4758_v40 = vld [vmem:[#allocation7 + $0x2c0] sm:$0xff]  }
 0x2a9   : > { %v5278_v45 = vmax.f32 %v1186_v44, 0.0  ;;  %v4759_v44 = vld [vmem:[#allocation7 + $0x378] sm:$0xff]  }
 0x2ab   : > { %1189 = vst [vmem:[#allocation3 + $0x8] sm:$0xff] %v5278_v45  ;;  %v1211_v43 = vpack.c.bf16 %v5278_v45, %v5278_v45 }
 0x2ad   : > { %4205 = vmatmul.mubr.bf16.vlgmr.msra.gmra.mxu1 %v1211_v43  ;;  %v4761_v43 = vld [vmem:[#allocation7 + $0x370] sm:$0xff]  }
 0x2ae   : > { %4229 = vmatpush3.bf16.msra.mxu1 %v4727_v46  ;;  %4244 = vmatprep.mubr.msk.bf16.mxu1 %vm4999_vm2, %v4997_v0  ;;  %v4760_v46 = vld [vmem:[#allocation7 + $0x338] sm:$0xff]  }
 0x2af   : > { %4230 = vmatprep.subr.bf16.mxu1 %v4997_v0 }
 0x2b2   : > { %v1191_v48 = vld [vmem:[#allocation3 + $0x7] sm:$0xff]  ;;  %4231 = vmatpush3.bf16.msra.mxu1 %v4728_v47  ;;  %v4762_v47 = vld [vmem:[#allocation7 + $0x330] sm:$0xff]  }
 0x2b3   : > { %v1405_v50 = vld [vmem:[#allocation3 + $0x9] sm:$0xff]  ;;  %v1192_v51 = vpack.c.bf16 %v1191_v48, %v1191_v48  ;;  %1866 = vst [vmem:[#allocation3 + $0x7] sm:$0x1] %v4997_v0  ;;  %4232 = vmatprep.subr.bf16.mxu1 %v4997_v0 }
 0x2b4   : > { %1868 = vst [vmem:[#allocation3 + $0x10] sm:$0x1] %v4997_v0  ;;  %v1406_v57 = vpack.c.bf16 %v1405_v50, %v1405_v50  ;;  %v4763_v48 = vld [vmem:[#allocation7 + $0x368] sm:$0xff]   ;;  %v4765_v50 = vld [vmem:[#allocation7 + $0x360] sm:$0xff]  }
 0x2b5   : > { %4225 = vmatmul.mubr.bf16.vlgmr.msra.gmra.mxu0 %v1192_v51  ;;  %v4766_v51 = vld [vmem:[#allocation7 + $0x320] sm:$0xff]  }
 0x2b6   : > { %4233 = vmatpush3.bf16.msra.mxu1 %v4729_v49  ;;  %4264 = vmatprep.mubr.msk.bf16.mxu0 %vm4999_vm2, %v4997_v0  ;;  %v4764_v49 = vld [vmem:[#allocation7 + $0x328] sm:$0xff]  }
 0x2b7   : > { %4234 = vmatprep.subr.bf16.mxu1 %v4997_v0  ;;  %4249 = vmatpush3.bf16.msra.mxu0 %v4735_v58  ;;  %v4773_v58 = vld [vmem:[#allocation7 + $0x340] sm:$0xff]  }
 0x2b8   : > { %4250 = vmatprep.subr.bf16.mxu0 %v4997_v0 }
 0x2ba   : > { %4235 = vmatpush3.bf16.msra.mxu1 %v4730_v52  ;;  %v4767_v52 = vld [vmem:[#allocation7 + $0x358] sm:$0xff]  }
 0x2bb   : > { %4236 = vmatprep.subr.bf16.mxu1 %v4997_v0  ;;  %4251 = vmatpush3.bf16.msra.mxu0 %v4737_v59  ;;  %v4774_v59 = vld [vmem:[#allocation7 + $0x300] sm:$0xff]  }
 0x2bc   : > { %4252 = vmatprep.subr.bf16.mxu0 %v4997_v0 }
 0x2be   : > { %4237 = vmatpush3.bf16.msra.mxu1 %v4731_v53  ;;  %v4768_v53 = vld [vmem:[#allocation7 + $0x318] sm:$0xff]  }
 0x2bf   : > { %4238 = vmatprep.subr.bf16.mxu1 %v4997_v0  ;;  %4253 = vmatpush3.bf16.msra.mxu0 %v4739_v61 }
 0x2c0   : > { %4254 = vmatprep.subr.bf16.mxu0 %v4997_v0 }
 0x2c2   : > { %4239 = vmatpush3.bf16.msra.mxu1 %v4732_v54  ;;  %v4769_v54 = vld [vmem:[#allocation7 + $0x350] sm:$0xff]  }
 0x2c3   : > { %4240 = vmatprep.subr.bf16.mxu1 %v4997_v0  ;;  %4255 = vmatpush3.bf16.msra.mxu0 %v4741_v63 }
 0x2c4   : > { %4256 = vmatprep.subr.bf16.mxu0 %v4997_v0 }
 0x2c6   : > { %4241 = vmatpush3.bf16.msra.mxu1 %v4733_v55  ;;  %v4770_v55 = vld [vmem:[#allocation7 + $0x310] sm:$0xff]  }
 0x2c7   : > { %4242 = vmatprep.subr.bf16.mxu1 %v4997_v0  ;;  %4257 = vmatpush3.bf16.msra.mxu0 %v4743_v2 }
 0x2c8   : > { %4258 = vmatprep.subr.bf16.mxu0 %v4997_v0 }
 0x2ca   : > { %4243 = vmatpush3.bf16.msra.mxu1 %v4734_v56  ;;  %v4771_v56 = vld [vmem:[#allocation7 + $0x348] sm:$0xff]  }
 0x2cb   : > { %4268 = vmatprep.subr.bf16.mxu1 %v4997_v0  ;;  %4259 = vmatpush3.bf16.msra.mxu0 %v4745_v3 }
 0x2cc   : > { %4260 = vmatprep.subr.bf16.mxu0 %v4997_v0 }
 0x2cd   : > { %4245 = vmatmul.mubr.bf16.vlgmr.msra.gmra.mxu1 %v1406_v57  ;;  %v4772_v57 = vld [vmem:[#allocation7 + $0x308] sm:$0xff]  }
 0x2ce   : > { %4284 = vmatprep.mubr.msk.bf16.mxu1 %vm4999_vm2, %v4997_v0  ;;  %4269 = vmatpush3.bf16.msra.mxu1 %v4736_v60 }
 0x2cf   : > { %4270 = vmatprep.subr.bf16.mxu1 %v4997_v0  ;;  %4261 = vmatpush3.bf16.msra.mxu0 %v4747_v5 }
 0x2d0   : > { %4262 = vmatprep.subr.bf16.mxu0 %v4997_v0 }
 0x2d2   : > { %4271 = vmatpush3.bf16.msra.mxu1 %v4738_v62 }
 0x2d3   : > { %4272 = vmatprep.subr.bf16.mxu1 %v4997_v0  ;;  %4263 = vmatpush3.bf16.msra.mxu0 %v4749_v7  ;;  %v3677_v7 = vld [vmem:[%s5589_s5 + $0x5] ss:$0 sm:$0xff] }
 0x2d4   : > { %4288 = vmatprep.subr.bf16.mxu0 %v4997_v0 }
 0x2d6   : > { %4273 = vmatpush3.bf16.msra.mxu1 %v4740_v1 }
 0x2d7   : > { %4274 = vmatprep.subr.bf16.mxu1 %v4997_v0 }
 0x2da   : > { %4275 = vmatpush3.bf16.msra.mxu1 %v4742_v4 }
 0x2db   : > { %4276 = vmatprep.subr.bf16.mxu1 %v4997_v0 }
 0x2de   : > { %4277 = vmatpush3.bf16.msra.mxu1 %v4744_v6 }
 0x2df   : > { %4278 = vmatprep.subr.bf16.mxu1 %v4997_v0 }
 0x2e2   : > { %4279 = vmatpush3.bf16.msra.mxu1 %v4746_v8 }
 0x2e3   : > { %4280 = vmatprep.subr.bf16.mxu1 %v4997_v0 }
 0x2e6   : > { %4281 = vmatpush3.bf16.msra.mxu1 %v4748_v9  ;;  %v3678_v9 = vld [vmem:[%s5590_s6 + $0x5] ss:$0 sm:$0xff] }
 0x2e7   : > { %4282 = vmatprep.subr.bf16.mxu1 %v4997_v0 }
 0x2ea   : > { %4283 = vmatpush3.bf16.msra.mxu1 %v4750_v10 }
 0x2eb   : > { %4308 = vmatprep.subr.bf16.mxu1 %v4997_v0 }
 0x36d   : > { %v1311_v11 = vpop.f32.mrf.mxu1 }
 0x36f   : > { %v4206_v12 = vpop.f32.mrf.mxu1 }
 0x371   : > { %v1314_v13 = vpop.f32.mrf.mxu1 }
 0x373   : > { %v4207_v14 = vpop.f32.mrf.mxu1 }
 0x375   : > { %v1399_v15 = vpop.f32.mrf.mxu0 }
 0x376   : > { %v1400_v19 = vadd.f32 %v1399_v15, %v1311_v11 }
 0x377   : > { %v4226_v16 = vpop.f32.mrf.mxu0 }
 0x379   : > { %v1402_v17 = vpop.f32.mrf.mxu0 }
 0x37a   : > { %v4775_v17 = vld [vmem:[#allocation7 + $0x3b8] sm:$0xff]  }
 0x37b   : > { %v4227_v18 = vpop.f32.mrf.mxu0 }
 0x37c   : > { %v4776_v18 = vld [vmem:[#allocation10 + $0x78] sm:$0xff]  }
 0x38d   : > { %v1506_v20 = vpop.f32.mrf.mxu1 }
 0x38e   : > { %v1512_v22 = vadd.f32 %v1506_v20, %v1400_v19 }
 0x38f   : > { %v4246_v24 = vpop.f32.mrf.mxu1 }
 0x390   : > { %v1518_v25 = vmul.f32 %v3651_v21, %v1512_v22  ;;  %v4778_v24 = vld [vmem:[#allocation10 + $0x70] sm:$0xff]  }
 0x391   : > { %v1509_v26 = vpop.f32.mrf.mxu1 }
 0x392   : > { %v1524_v27 = vadd.f32 %v3652_v23, %v1518_v25  ;;  %v4777_v23 = vld [vmem:[#allocation7 + $0x3b0] sm:$0xff]   ;;  %v4780_v25 = vld [vmem:[#allocation10 + $0x68] sm:$0xff]   ;;  %v4781_v26 = vld [vmem:[#allocation7 + $0x3a0] sm:$0xff]  }
 0x393   : > { %v4247_v28 = vpop.f32.mrf.mxu1 }
 0x394   : > { %v1525_v29 = vmax.f32 %v1524_v27, 0.0  ;;  %v4782_v27 = vld [vmem:[#allocation10 + $0x60] sm:$0xff]   ;;  %v4783_v28 = vld [vmem:[#allocation7 + $0x398] sm:$0xff]  }
 0x396   : > { %1527 = vst [vmem:[#allocation4 + $0x8] sm:$0xff] %v1525_v29  ;;  %v1550_v31 = vpack.c.bf16 %v1525_v29, %v1525_v29  ;;  %v4784_v29 = vld [vmem:[#allocation10 + $0x58] sm:$0xff]  }
 0x398   : > { %4265 = vmatmul.mubr.bf16.vlgmr.msra.gmra.mxu0 %v1550_v31  ;;  %v4786_v31 = vld [vmem:[#allocation10 + $0x50] sm:$0xff]  }
 0x399   : > { %4289 = vmatpush3.bf16.msra.mxu0 %v4751_v30  ;;  %4304 = vmatprep.mubr.msk.bf16.mxu0 %vm4999_vm2, %v4997_v0  ;;  %v4785_v30 = vld [vmem:[#allocation7 + $0x390] sm:$0xff]  }
 0x39a   : > { %4290 = vmatprep.subr.bf16.mxu0 %v4997_v0 }
 0x39d   : > { %v1530_v33 = vld [vmem:[#allocation4 + $0x7] sm:$0xff]  ;;  %4291 = vmatpush3.bf16.msra.mxu0 %v4752_v32  ;;  %v4787_v32 = vld [vmem:[#allocation7 + $0x388] sm:$0xff]  }
 0x39e   : > { %v1531_v35 = vpack.c.bf16 %v1530_v33, %v1530_v33  ;;  %4292 = vmatprep.subr.bf16.mxu0 %v4997_v0  ;;  %v1744_v41 = vld [vmem:[#allocation4 + $0x9] sm:$0xff] }
 0x39f   : > { %v1745_v42 = vpack.c.bf16 %v1744_v41, %v1744_v41  ;;  %v4788_v33 = vld [vmem:[#allocation10 + $0x48] sm:$0xff]   ;;  %v4792_v41 = vld [vmem:[#allocation7 + $0x3f8] sm:$0xff]  }
 0x3a0   : > { %4285 = vmatmul.mubr.bf16.vlgmr.msra.gmra.mxu1 %v1531_v35  ;;  %v4790_v35 = vld [vmem:[#allocation10 + $0x40] sm:$0xff]  }
 0x3a1   : > { %4293 = vmatpush3.bf16.msra.mxu0 %v4753_v34  ;;  %4324 = vmatprep.mubr.msk.bf16.mxu1 %vm4999_vm2, %v4997_v0  ;;  %v4789_v34 = vld [vmem:[#allocation7 + $0x380] sm:$0xff]  }
 0x3a2   : > { %4294 = vmatprep.subr.bf16.mxu0 %v4997_v0  ;;  %4309 = vmatpush3.bf16.msra.mxu1 %v4759_v44  ;;  %v4794_v44 = vld [vmem:[#allocation7 + $0x3f0] sm:$0xff]  }
 0x3a3   : > { %4310 = vmatprep.subr.bf16.mxu1 %v4997_v0 }
 0x3a5   : > { %4295 = vmatpush3.bf16.msra.mxu0 %v4754_v36 }
 0x3a6   : > { %4296 = vmatprep.subr.bf16.mxu0 %v4997_v0  ;;  %4311 = vmatpush3.bf16.msra.mxu1 %v4761_v43  ;;  %v4796_v43 = vld [vmem:[#allocation7 + $0x3e8] sm:$0xff]  }
 0x3a7   : > { %4312 = vmatprep.subr.bf16.mxu1 %v4997_v0 }
 0x3a9   : > { %4297 = vmatpush3.bf16.msra.mxu0 %v4755_v37 }
 0x3aa   : > { %4298 = vmatprep.subr.bf16.mxu0 %v4997_v0  ;;  %4313 = vmatpush3.bf16.msra.mxu1 %v4763_v48  ;;  %v4798_v48 = vld [vmem:[#allocation7 + $0x3e0] sm:$0xff]  }
 0x3ab   : > { %4314 = vmatprep.subr.bf16.mxu1 %v4997_v0 }
 0x3ad   : > { %4299 = vmatpush3.bf16.msra.mxu0 %v4756_v38 }
 0x3ae   : > { %4300 = vmatprep.subr.bf16.mxu0 %v4997_v0  ;;  %4315 = vmatpush3.bf16.msra.mxu1 %v4765_v50  ;;  %v4800_v50 = vld [vmem:[#allocation7 + $0x3d8] sm:$0xff]  }
 0x3af   : > { %4316 = vmatprep.subr.bf16.mxu1 %v4997_v0 }
 0x3b1   : > { %4301 = vmatpush3.bf16.msra.mxu0 %v4757_v39 }
 0x3b2   : > { %4302 = vmatprep.subr.bf16.mxu0 %v4997_v0  ;;  %4317 = vmatpush3.bf16.msra.mxu1 %v4767_v52  ;;  %v4802_v52 = vld [vmem:[#allocation7 + $0x3d0] sm:$0xff]  }
 0x3b3   : > { %4318 = vmatprep.subr.bf16.mxu1 %v4997_v0 }
 0x3b5   : > { %4303 = vmatpush3.bf16.msra.mxu0 %v4758_v40  ;;  %v4791_v40 = vld [vmem:[#allocation7 + $0x438] sm:$0xff]  }
 0x3b6   : > { %4328 = vmatprep.subr.bf16.mxu0 %v4997_v0  ;;  %4319 = vmatpush3.bf16.msra.mxu1 %v4769_v54  ;;  %v4804_v54 = vld [vmem:[#allocation7 + $0x3c8] sm:$0xff]  }
 0x3b7   : > { %4320 = vmatprep.subr.bf16.mxu1 %v4997_v0 }
 0x3b8   : > { %4305 = vmatmul.mubr.bf16.vlgmr.msra.gmra.mxu0 %v1745_v42  ;;  %v4793_v42 = vld [vmem:[#allocation7 + $0x430] sm:$0xff]  }
 0x3b9   : > { %4344 = vmatprep.mubr.msk.bf16.mxu0 %vm4999_vm2, %v4997_v0  ;;  %4329 = vmatpush3.bf16.msra.mxu0 %v4760_v46  ;;  %v4795_v46 = vld [vmem:[#allocation7 + $0x428] sm:$0xff]  }
 0x3ba   : > { %4330 = vmatprep.subr.bf16.mxu0 %v4997_v0  ;;  %4321 = vmatpush3.bf16.msra.mxu1 %v4771_v56  ;;  %v4806_v56 = vld [vmem:[#allocation7 + $0x3c0] sm:$0xff]  }
 0x3bb   : > { %4322 = vmatprep.subr.bf16.mxu1 %v4997_v0 }
 0x3bd   : > { %4331 = vmatpush3.bf16.msra.mxu0 %v4762_v47  ;;  %v4797_v47 = vld [vmem:[#allocation7 + $0x420] sm:$0xff]  }
 0x3be   : > { %4332 = vmatprep.subr.bf16.mxu0 %v4997_v0  ;;  %4323 = vmatpush3.bf16.msra.mxu1 %v4773_v58 }
 0x3bf   : > { %4348 = vmatprep.subr.bf16.mxu1 %v4997_v0 }
 0x3c1   : > { %4333 = vmatpush3.bf16.msra.mxu0 %v4764_v49  ;;  %v4799_v49 = vld [vmem:[#allocation7 + $0x418] sm:$0xff]  }
 0x3c2   : > { %4334 = vmatprep.subr.bf16.mxu0 %v4997_v0 }
 0x3c5   : > { %4335 = vmatpush3.bf16.msra.mxu0 %v4766_v51  ;;  %v4801_v51 = vld [vmem:[#allocation7 + $0x410] sm:$0xff]  }
 0x3c6   : > { %4336 = vmatprep.subr.bf16.mxu0 %v4997_v0 }
 0x3c9   : > { %4337 = vmatpush3.bf16.msra.mxu0 %v4768_v53  ;;  %v4803_v53 = vld [vmem:[#allocation7 + $0x408] sm:$0xff]  }
 0x3ca   : > { %4338 = vmatprep.subr.bf16.mxu0 %v4997_v0 }
 0x3cd   : > { %4339 = vmatpush3.bf16.msra.mxu0 %v4770_v55  ;;  %v4805_v55 = vld [vmem:[#allocation7 + $0x400] sm:$0xff]  }
 0x3ce   : > { %4340 = vmatprep.subr.bf16.mxu0 %v4997_v0 }
 0x3d1   : > { %4341 = vmatpush3.bf16.msra.mxu0 %v4772_v57 }
 0x3d2   : > { %4342 = vmatprep.subr.bf16.mxu0 %v4997_v0 }
 0x3d5   : > { %4343 = vmatpush3.bf16.msra.mxu0 %v4774_v59 }
 0x3d6   : > { %4368 = vmatprep.subr.bf16.mxu0 %v4997_v0 }
 0x458   : > { %v1650_v60 = vpop.f32.mrf.mxu0 }
 0x45a   : > { %v4266_v61 = vpop.f32.mrf.mxu0 }
 0x45c   : > { %v1653_v62 = vpop.f32.mrf.mxu0 }
 0x45e   : > { %v4267_v63 = vpop.f32.mrf.mxu0 }
 0x460   : > { %v1738_v1 = vpop.f32.mrf.mxu1 }
 0x461   : > { %v1739_v5 = vadd.f32 %v1738_v1, %v1650_v60 }
 0x462   : > { %v4286_v2 = vpop.f32.mrf.mxu1 }
 0x464   : > { %v1741_v3 = vpop.f32.mrf.mxu1 }
 0x466   : > { %v4287_v4 = vpop.f32.mrf.mxu1 }
 0x467   : > { %v3703_v4 = vld [vmem:[%s5589_s5 + $0x6] ss:$0 sm:$0xff] }
 0x478   : > { %v1845_v6 = vpop.f32.mrf.mxu0 }
 0x479   : > { %v1851_v8 = vadd.f32 %v1845_v6, %v1739_v5 }
 0x47a   : > { %v4306_v10 = vpop.f32.mrf.mxu0 }
 0x47b   : > { %v1857_v11 = vmul.f32 %v3677_v7, %v1851_v8  ;;  %v3704_v7 = vld [vmem:[%s5590_s6 + $0x6] ss:$0 sm:$0xff] }
 0x47c   : > { %v1848_v12 = vpop.f32.mrf.mxu0 }
 0x47d   : > { %v1863_v13 = vadd.f32 %v3678_v9, %v1857_v11 }
 0x47e   : > { %v4307_v14 = vpop.f32.mrf.mxu0 }
 0x47f   : > { %v1864_v15 = vadd.f32 %v1863_v13, %v5278_v45  ;;  %v4779_v45 = vld [vmem:[#allocation7 + $0x3a8] sm:$0xff]  }
 0x481   : > { %v1865_v16 = vmax.f32 %v1864_v15, 0.0 }
 0x483   : > { %1867 = vst [vmem:[#allocation3 + $0x8] sm:$0xff] %v1865_v16 }
 0x48a   : > { %v1890_v19 = vld [vmem:[#allocation3 + $0x8] ss:$2 sm:$0xf]  ;;  %v1870_v20 = vld [vmem:[#allocation3 + $0x7] ss:$2 sm:$0xf] }
 0x48b   : > { %v1891_v21 = vpack.c.bf16 %v1890_v19, %v1890_v19  ;;  %v1871_v22 = vpack.c.bf16 %v1870_v20, %v1870_v20  ;;  %v2086_v36 = vld [vmem:[#allocation3 + $0x9] ss:$2 sm:$0xf]  ;;  %v2210_v37 = vld [vmem:[#allocation3 + $0x8] ss:$2 sm:$0xf] }
 0x48c   : > { %v2087_v38 = vpack.c.bf16 %v2086_v36, %v2086_v36  ;;  %v2211_v39 = vpack.c.bf16 %v2210_v37, %v2210_v37  ;;  %v4821_v36 = vld [vmem:[#allocation7 + $0x4e0] sm:$0xff]  }
 0x48d   : > { %4325 = vmatmul.mubr.bf16.vlgmr.msra.gmra.mxu1 %v1891_v21  ;;  %4345 = vmatmul.mubr.bf16.vlgmr.msra.gmra.mxu0 %v1871_v22  ;;  %v4822_v37 = vld [vmem:[#allocation7 + $0x4a0] sm:$0xff]  }
 0x48e   : > { %4349 = vmatpush3.bf16.msra.mxu1 %v4775_v17  ;;  %4369 = vmatpush3.bf16.msra.mxu0 %v4776_v18  ;;  %v4807_v17 = vld [vmem:[#allocation7 + $0x478] sm:$0xff]  }
 0x48f   : > { %4350 = vmatprep.subr.bf16.mxu1 %v4997_v0  ;;  %4370 = vmatprep.subr.bf16.mxu0 %v4997_v0 }
 0x490   : > { %4364 = vmatprep.mubr.msk.bf16.mxu1 %vm4999_vm2, %v4997_v0  ;;  %4384 = vmatprep.mubr.msk.bf16.mxu0 %vm4999_vm2, %v4997_v0 }
 0x492   : > { %4351 = vmatpush3.bf16.msra.mxu1 %v4777_v23  ;;  %4371 = vmatpush3.bf16.msra.mxu0 %v4778_v24  ;;  %v4808_v23 = vld [vmem:[#allocation7 + $0x470] sm:$0xff]   ;;  %v4809_v24 = vld [vmem:[#allocation7 + $0x468] sm:$0xff]  }
 0x493   : > { %4352 = vmatprep.subr.bf16.mxu1 %v4997_v0  ;;  %4372 = vmatprep.subr.bf16.mxu0 %v4997_v0 }
 0x496   : > { %4353 = vmatpush3.bf16.msra.mxu1 %v4779_v45  ;;  %4373 = vmatpush3.bf16.msra.mxu0 %v4780_v25  ;;  %v4810_v45 = vld [vmem:[#allocation7 + $0x460] sm:$0xff]   ;;  %v4811_v25 = vld [vmem:[#allocation7 + $0x458] sm:$0xff]  }
 0x497   : > { %4354 = vmatprep.subr.bf16.mxu1 %v4997_v0  ;;  %4374 = vmatprep.subr.bf16.mxu0 %v4997_v0 }
 0x49a   : > { %4355 = vmatpush3.bf16.msra.mxu1 %v4781_v26  ;;  %4375 = vmatpush3.bf16.msra.mxu0 %v4782_v27  ;;  %v4812_v26 = vld [vmem:[#allocation7 + $0x450] sm:$0xff]   ;;  %v4813_v27 = vld [vmem:[#allocation7 + $0x448] sm:$0xff]  }
 0x49b   : > { %4356 = vmatprep.subr.bf16.mxu1 %v4997_v0  ;;  %4376 = vmatprep.subr.bf16.mxu0 %v4997_v0 }
 0x49e   : > { %4357 = vmatpush3.bf16.msra.mxu1 %v4783_v28  ;;  %4377 = vmatpush3.bf16.msra.mxu0 %v4784_v29  ;;  %v4814_v28 = vld [vmem:[#allocation7 + $0x440] sm:$0xff]  }
 0x49f   : > { %4358 = vmatprep.subr.bf16.mxu1 %v4997_v0  ;;  %4378 = vmatprep.subr.bf16.mxu0 %v4997_v0 }
 0x4a2   : > { %4359 = vmatpush3.bf16.msra.mxu1 %v4785_v30  ;;  %4379 = vmatpush3.bf16.msra.mxu0 %v4786_v31  ;;  %v4815_v30 = vld [vmem:[#allocation7 + $0x4f8] sm:$0xff]  }
 0x4a3   : > { %4360 = vmatprep.subr.bf16.mxu1 %v4997_v0  ;;  %4380 = vmatprep.subr.bf16.mxu0 %v4997_v0  ;;  %v4816_v31 = vld [vmem:[#allocation7 + $0x4b8] sm:$0xff]  }
 0x4a6   : > { %4361 = vmatpush3.bf16.msra.mxu1 %v4787_v32  ;;  %4381 = vmatpush3.bf16.msra.mxu0 %v4788_v33  ;;  %v4817_v32 = vld [vmem:[#allocation7 + $0x4f0] sm:$0xff]  }
 0x4a7   : > { %4362 = vmatprep.subr.bf16.mxu1 %v4997_v0  ;;  %4382 = vmatprep.subr.bf16.mxu0 %v4997_v0  ;;  %v4818_v33 = vld [vmem:[#allocation7 + $0x4b0] sm:$0xff]  }
 0x4aa   : > { %4363 = vmatpush3.bf16.msra.mxu1 %v4789_v34  ;;  %4383 = vmatpush3.bf16.msra.mxu0 %v4790_v35  ;;  %v4819_v34 = vld [vmem:[#allocation7 + $0x4e8] sm:$0xff]  }
 0x4ab   : > { %4388 = vmatprep.subr.bf16.mxu1 %v4997_v0  ;;  %4408 = vmatprep.subr.bf16.mxu0 %v4997_v0  ;;  %v4820_v35 = vld [vmem:[#allocation7 + $0x4a8] sm:$0xff]  }
 0x4ad   : > { %4365 = vmatmul.mubr.bf16.vlgmr.msra.gmra.mxu1 %v2087_v38  ;;  %4385 = vmatmul.mubr.bf16.vlgmr.msra.gmra.mxu0 %v2211_v39  ;;  %v4823_v38 = vld [vmem:[#allocation7 + $0x4d8] sm:$0xff]  }
 0x4ae   : > { %4404 = vmatprep.mubr.msk.bf16.mxu1 %vm4999_vm2, %v4997_v0  ;;  %4424 = vmatprep.mubr.msk.bf16.mxu0 %vm4999_vm2, %v4997_v0  ;;  %v4824_v39 = vld [vmem:[#allocation7 + $0x498] sm:$0xff]  }
 0x4af   : > { %4389 = vmatpush3.bf16.msra.mxu1 %v4791_v40  ;;  %4409 = vmatpush3.bf16.msra.mxu0 %v4792_v41  ;;  %v4825_v40 = vld [vmem:[#allocation7 + $0x4d0] sm:$0xff]  }
 0x4b0   : > { %4390 = vmatprep.subr.bf16.mxu1 %v4997_v0  ;;  %4410 = vmatprep.subr.bf16.mxu0 %v4997_v0  ;;  %v4826_v41 = vld [vmem:[#allocation7 + $0x490] sm:$0xff]  }
 0x4b3   : > { %4391 = vmatpush3.bf16.msra.mxu1 %v4793_v42  ;;  %4411 = vmatpush3.bf16.msra.mxu0 %v4794_v44  ;;  %v4827_v42 = vld [vmem:[#allocation7 + $0x4c8] sm:$0xff]  }
 0x4b4   : > { %4392 = vmatprep.subr.bf16.mxu1 %v4997_v0  ;;  %4412 = vmatprep.subr.bf16.mxu0 %v4997_v0  ;;  %v4828_v44 = vld [vmem:[#allocation7 + $0x488] sm:$0xff]  }
 0x4b7   : > { %4393 = vmatpush3.bf16.msra.mxu1 %v4795_v46  ;;  %4413 = vmatpush3.bf16.msra.mxu0 %v4796_v43  ;;  %v4829_v46 = vld [vmem:[#allocation7 + $0x4c0] sm:$0xff]  }
 0x4b8   : > { %4394 = vmatprep.subr.bf16.mxu1 %v4997_v0  ;;  %4414 = vmatprep.subr.bf16.mxu0 %v4997_v0  ;;  %v4830_v43 = vld [vmem:[#allocation7 + $0x480] sm:$0xff]  }
 0x4bb   : > { %4395 = vmatpush3.bf16.msra.mxu1 %v4797_v47  ;;  %4415 = vmatpush3.bf16.msra.mxu0 %v4798_v48 }
 0x4bc   : > { %4396 = vmatprep.subr.bf16.mxu1 %v4997_v0  ;;  %4416 = vmatprep.subr.bf16.mxu0 %v4997_v0 }
 0x4bf   : > { %4397 = vmatpush3.bf16.msra.mxu1 %v4799_v49  ;;  %4417 = vmatpush3.bf16.msra.mxu0 %v4800_v50 }
 0x4c0   : > { %4398 = vmatprep.subr.bf16.mxu1 %v4997_v0  ;;  %4418 = vmatprep.subr.bf16.mxu0 %v4997_v0 }
 0x4c3   : > { %4399 = vmatpush3.bf16.msra.mxu1 %v4801_v51  ;;  %4419 = vmatpush3.bf16.msra.mxu0 %v4802_v52 }
 0x4c4   : > { %4400 = vmatprep.subr.bf16.mxu1 %v4997_v0  ;;  %4420 = vmatprep.subr.bf16.mxu0 %v4997_v0 }
 0x4c7   : > { %4401 = vmatpush3.bf16.msra.mxu1 %v4803_v53  ;;  %4421 = vmatpush3.bf16.msra.mxu0 %v4804_v54 }
 0x4c8   : > { %4402 = vmatprep.subr.bf16.mxu1 %v4997_v0  ;;  %4422 = vmatprep.subr.bf16.mxu0 %v4997_v0 }
 0x4cb   : > { %4403 = vmatpush3.bf16.msra.mxu1 %v4805_v55  ;;  %4423 = vmatpush3.bf16.msra.mxu0 %v4806_v56  ;;  %v3713_v55 = vld [vmem:[%s5589_s5 + $0x8] ss:$0 sm:$0xff] }
 0x4cc   : > { %4428 = vmatprep.subr.bf16.mxu1 %v4997_v0  ;;  %4448 = vmatprep.subr.bf16.mxu0 %v4997_v0 }
 0x54d   : > { %v1991_v57 = vpop.f32.mrf.mxu1  ;;  %v2079_v58 = vpop.f32.mrf.mxu0 }
 0x54e   : > { %v2080_v2 = vadd.f32 %v2079_v58, %v1991_v57  ;;  %v3739_v58 = vld [vmem:[%s5589_s5 + $0x7] ss:$0 sm:$0xff] }
 0x54f   : > { %v4326_v59 = vpop.f32.mrf.mxu1  ;;  %v4346_v60 = vpop.f32.mrf.mxu0 }
 0x551   : > { %v1994_v61 = vpop.f32.mrf.mxu1  ;;  %v2082_v62 = vpop.f32.mrf.mxu0 }
 0x552   : > { %v3714_v61 = vld [vmem:[%s5590_s6 + $0x8] ss:$0 sm:$0xff]  ;;  %v3740_v62 = vld [vmem:[%s5590_s6 + $0x7] ss:$0 sm:$0xff] }
 0x553   : > { %v4327_v63 = vpop.f32.mrf.mxu1  ;;  %v4347_v1 = vpop.f32.mrf.mxu0 }
 0x56d   : > { %v2187_v3 = vpop.f32.mrf.mxu1  ;;  %v5401_v5 = vpop.f32.mrf.mxu0 }
 0x56e   : > { %v2193_v6 = vadd.f32 %v2187_v3, %v2080_v2  ;;  %v2322_v59 = vmul.f32 %v3713_v55, %v5401_v5 }
 0x56f   : > { %v4366_v8 = vpop.f32.mrf.mxu1  ;;  %v4386_v9 = vpop.f32.mrf.mxu0 }
 0x570   : > { %v2199_v10 = vmul.f32 %v3703_v4, %v2193_v6  ;;  %v2328_v3 = vadd.f32 %v3714_v61, %v2322_v59  ;;  %v4855_v59 = vld [vmem:[#allocation7 + $0x5f8] sm:$0xff]  }
 0x571   : > { %v2190_v11 = vpop.f32.mrf.mxu1  ;;  %v2314_v12 = vpop.f32.mrf.mxu0 }
 0x572   : > { %v2205_v13 = vadd.f32 %v3704_v7, %v2199_v10  ;;  %v4831_v10 = vld [vmem:[#allocation7 + $0x538] sm:$0xff]  }
 0x573   : > { %v4367_v14 = vpop.f32.mrf.mxu1  ;;  %v4387_v15 = vpop.f32.mrf.mxu0 }
 0x574   : > { %v2206_v16 = vmax.f32 %v2205_v13, 0.0  ;;  %v4832_v13 = vld [vmem:[#allocation7 + $0x530] sm:$0xff]   ;;  %v4833_v14 = vld [vmem:[#allocation7 + $0x528] sm:$0xff]   ;;  %v4834_v15 = vld [vmem:[#allocation7 + $0x520] sm:$0xff]  }
 0x576   : > { %2208 = vst [vmem:[#allocation6 + $0x8] sm:$0xf] %v2206_v16  ;;  %v4835_v16 = vld [vmem:[#allocation7 + $0x518] sm:$0xff]  }
 0x57d   : > { %v2348_v18 = vld [vmem:[#allocation6 + $0x8] sm:$0xf] }
 0x57e   : > { %v2329_v19 = vld [vmem:[#allocation6 + $0x7] sm:$0xf]  ;;  %v2349_v21 = vpack.c.bf16 %v2348_v18, %v2348_v18 }
 0x57f   : > { %v2543_v20 = vld [vmem:[#allocation6 + $0x9] sm:$0xf]  ;;  %v2330_v22 = vpack.c.bf16 %v2329_v19, %v2329_v19  ;;  %3003 = vst [vmem:[#allocation6 + $0x7] sm:$0x1] %v4997_v0  ;;  %v4837_v18 = vld [vmem:[#allocation7 + $0x508] sm:$0xff]   ;;  %v4838_v19 = vld [vmem:[#allocation7 + $0x500] sm:$0xff]  }
 0x580   : > { %3005 = vst [vmem:[#allocation6 + $0xc] sm:$0x1] %v4997_v0  ;;  %4405 = vmatmul.mubr.bf16.vlgmr.msra.gmra.mxu1 %v2349_v21  ;;  %v2544_v29 = vpack.c.bf16 %v2543_v20, %v2543_v20 }
 0x581   : > { %4425 = vmatmul.mubr.bf16.vlgmr.msra.gmra.mxu0 %v2330_v22  ;;  %4429 = vmatpush3.bf16.msra.mxu1 %v4807_v17  ;;  %v4836_v17 = vld [vmem:[#allocation7 + $0x510] sm:$0xff]   ;;  %v4839_v22 = vld [vmem:[#allocation7 + $0x5b8] sm:$0xff]  }
 0x582   : > { %4444 = vmatprep.mubr.msk.bf16.mxu1 %vm4999_vm2, %v4997_v0  ;;  %4430 = vmatprep.subr.bf16.mxu1 %v4997_v0 }
 0x583   : > { %4464 = vmatprep.mubr.msk.bf16.mxu0 %vm4999_vm2, %v4997_v0  ;;  %4449 = vmatpush3.bf16.msra.mxu0 %v4815_v30  ;;  %v4848_v30 = vld [vmem:[#allocation7 + $0x558] sm:$0xff]  }
 0x584   : > { %4450 = vmatprep.subr.bf16.mxu0 %v4997_v0 }
 0x585   : > { %4431 = vmatpush3.bf16.msra.mxu1 %v4808_v23  ;;  %v4840_v23 = vld [vmem:[#allocation7 + $0x578] sm:$0xff]  }
 0x586   : > { %4432 = vmatprep.subr.bf16.mxu1 %v4997_v0 }
 0x587   : > { %4451 = vmatpush3.bf16.msra.mxu0 %v4817_v32  ;;  %v4850_v32 = vld [vmem:[#allocation7 + $0x550] sm:$0xff]  }
 0x588   : > { %4452 = vmatprep.subr.bf16.mxu0 %v4997_v0 }
 0x589   : > { %4433 = vmatpush3.bf16.msra.mxu1 %v4809_v24  ;;  %v4841_v24 = vld [vmem:[#allocation7 + $0x5b0] sm:$0xff]  }
 0x58a   : > { %4434 = vmatprep.subr.bf16.mxu1 %v4997_v0 }
 0x58b   : > { %4453 = vmatpush3.bf16.msra.mxu0 %v4819_v34  ;;  %v4852_v34 = vld [vmem:[#allocation7 + $0x548] sm:$0xff]  }
 0x58c   : > { %4454 = vmatprep.subr.bf16.mxu0 %v4997_v0 }
 0x58d   : > { %4435 = vmatpush3.bf16.msra.mxu1 %v4810_v45  ;;  %v4842_v45 = vld [vmem:[#allocation7 + $0x570] sm:$0xff]  }
 0x58e   : > { %4436 = vmatprep.subr.bf16.mxu1 %v4997_v0 }
 0x58f   : > { %4455 = vmatpush3.bf16.msra.mxu0 %v4821_v36  ;;  %v4854_v36 = vld [vmem:[#allocation7 + $0x540] sm:$0xff]  }
 0x590   : > { %4456 = vmatprep.subr.bf16.mxu0 %v4997_v0 }
 0x591   : > { %4437 = vmatpush3.bf16.msra.mxu1 %v4811_v25  ;;  %v4843_v25 = vld [vmem:[#allocation7 + $0x5a8] sm:$0xff]  }
 0x592   : > { %4438 = vmatprep.subr.bf16.mxu1 %v4997_v0 }
 0x593   : > { %4457 = vmatpush3.bf16.msra.mxu0 %v4823_v38 }
 0x594   : > { %4458 = vmatprep.subr.bf16.mxu0 %v4997_v0 }
 0x595   : > { %4439 = vmatpush3.bf16.msra.mxu1 %v4812_v26  ;;  %v4844_v26 = vld [vmem:[#allocation7 + $0x568] sm:$0xff]  }
 0x596   : > { %4440 = vmatprep.subr.bf16.mxu1 %v4997_v0 }
 0x597   : > { %4459 = vmatpush3.bf16.msra.mxu0 %v4825_v40 }
 0x598   : > { %4460 = vmatprep.subr.bf16.mxu0 %v4997_v0 }
 0x599   : > { %4441 = vmatpush3.bf16.msra.mxu1 %v4813_v27  ;;  %v4845_v27 = vld [vmem:[#allocation7 + $0x5a0] sm:$0xff]  }
 0x59a   : > { %4442 = vmatprep.subr.bf16.mxu1 %v4997_v0 }
 0x59b   : > { %4461 = vmatpush3.bf16.msra.mxu0 %v4827_v42 }
 0x59c   : > { %4462 = vmatprep.subr.bf16.mxu0 %v4997_v0 }
 0x59d   : > { %4443 = vmatpush3.bf16.msra.mxu1 %v4814_v28  ;;  %v4846_v28 = vld [vmem:[#allocation7 + $0x560] sm:$0xff]  }
 0x59e   : > { %4468 = vmatprep.subr.bf16.mxu1 %v4997_v0 }
 0x59f   : > { %4463 = vmatpush3.bf16.msra.mxu0 %v4829_v46 }
 0x5a0   : > { %4445 = vmatmul.mubr.bf16.vlgmr.msra.gmra.mxu1 %v2544_v29  ;;  %4488 = vmatprep.subr.bf16.mxu0 %v4997_v0  ;;  %v4847_v29 = vld [vmem:[#allocation7 + $0x598] sm:$0xff]  }
 0x5a1   : > { %4484 = vmatprep.mubr.msk.bf16.mxu1 %vm4999_vm2, %v4997_v0  ;;  %4469 = vmatpush3.bf16.msra.mxu1 %v4816_v31  ;;  %v4849_v31 = vld [vmem:[#allocation7 + $0x590] sm:$0xff]  }
 0x5a2   : > { %4470 = vmatprep.subr.bf16.mxu1 %v4997_v0 }
 0x5a5   : > { %4471 = vmatpush3.bf16.msra.mxu1 %v4818_v33  ;;  %v4851_v33 = vld [vmem:[#allocation7 + $0x588] sm:$0xff]  }
 0x5a6   : > { %4472 = vmatprep.subr.bf16.mxu1 %v4997_v0 }
 0x5a9   : > { %4473 = vmatpush3.bf16.msra.mxu1 %v4820_v35  ;;  %v4853_v35 = vld [vmem:[#allocation7 + $0x580] sm:$0xff]  }
 0x5aa   : > { %4474 = vmatprep.subr.bf16.mxu1 %v4997_v0 }
 0x5ad   : > { %4475 = vmatpush3.bf16.msra.mxu1 %v4822_v37 }
 0x5ae   : > { %4476 = vmatprep.subr.bf16.mxu1 %v4997_v0 }
 0x5b1   : > { %4477 = vmatpush3.bf16.msra.mxu1 %v4824_v39 }
 0x5b2   : > { %4478 = vmatprep.subr.bf16.mxu1 %v4997_v0 }
 0x5b5   : > { %4479 = vmatpush3.bf16.msra.mxu1 %v4826_v41 }
 0x5b6   : > { %4480 = vmatprep.subr.bf16.mxu1 %v4997_v0 }
 0x5b9   : > { %4481 = vmatpush3.bf16.msra.mxu1 %v4828_v44 }
 0x5ba   : > { %4482 = vmatprep.subr.bf16.mxu1 %v4997_v0 }
 0x5bd   : > { %4483 = vmatpush3.bf16.msra.mxu1 %v4830_v43 }
 0x5be   : > { %4508 = vmatprep.subr.bf16.mxu1 %v4997_v0 }
 0x640   : > { %v2449_v47 = vpop.f32.mrf.mxu1 }
 0x641   : > { %v2537_v48 = vpop.f32.mrf.mxu0 }
 0x642   : > { %v4406_v49 = vpop.f32.mrf.mxu1  ;;  %v2538_v56 = vadd.f32 %v2537_v48, %v2449_v47  ;;  %v3765_v48 = vld [vmem:[%s5589_s5 + $0x9] ss:$0 sm:$0xff] }
 0x643   : > { %v4426_v50 = vpop.f32.mrf.mxu0 }
 0x644   : > { %v2452_v51 = vpop.f32.mrf.mxu1  ;;  %v3766_v50 = vld [vmem:[%s5590_s6 + $0x9] ss:$0 sm:$0xff] }
 0x645   : > { %v2540_v52 = vpop.f32.mrf.mxu0 }
 0x646   : > { %v4407_v53 = vpop.f32.mrf.mxu1 }
 0x647   : > { %v4427_v54 = vpop.f32.mrf.mxu0 }
 0x660   : > { %v2644_v57 = vpop.f32.mrf.mxu1 }
 0x661   : > { %v2650_v60 = vadd.f32 %v2644_v57, %v2538_v56 }
 0x662   : > { %v4446_v63 = vpop.f32.mrf.mxu1 }
 0x663   : > { %v2656_v1 = vmul.f32 %v3739_v58, %v2650_v60  ;;  %v4857_v63 = vld [vmem:[#allocation7 + $0x5e8] sm:$0xff]  }
 0x664   : > { %v2647_v2 = vpop.f32.mrf.mxu1 }
 0x665   : > { %v2662_v4 = vadd.f32 %v3740_v62, %v2656_v1  ;;  %v4856_v62 = vld [vmem:[#allocation7 + $0x5f0] sm:$0xff]   ;;  %v4858_v1 = vld [vmem:[#allocation7 + $0x5e0] sm:$0xff]   ;;  %v4859_v2 = vld [vmem:[#allocation7 + $0x5d8] sm:$0xff]  }
 0x666   : > { %v4447_v6 = vpop.f32.mrf.mxu1 }
 0x667   : > { %v2663_v7 = vadd.f32 %v2662_v4, %v2328_v3  ;;  %v4860_v3 = vld [vmem:[#allocation7 + $0x5d0] sm:$0xff]   ;;  %v4861_v4 = vld [vmem:[#allocation7 + $0x5c8] sm:$0xff]   ;;  %v4862_v6 = vld [vmem:[#allocation7 + $0x5c0] sm:$0xff]  }
 0x669   : > { %v2664_v8 = vmax.f32 %v2663_v7, 0.0 }
 0x66b   : > { %2666 = vst [vmem:[#allocation5 + $0x8] sm:$0xf] %v2664_v8 }
 0x672   : > { %v2687_v9 = vld [vmem:[#allocation5 + $0x8] sm:$0xf] }
 0x673   : > { %v2668_v5 = vld [vmem:[#allocation5 + $0x7] sm:$0xf]  ;;  %v2688_v11 = vpack.c.bf16 %v2687_v9, %v2687_v9 }
 0x674   : > { %v2669_v12 = vpack.c.bf16 %v2668_v5, %v2668_v5  ;;  %v2882_v20 = vld [vmem:[#allocation5 + $0x9] sm:$0xf]  ;;  %v4864_v5 = vld [vmem:[%s5588_s4 + $0x30] sm:$0xff]  }
 0x675   : > { %4465 = vmatmul.mubr.bf16.vlgmr.msra.gmra.mxu0 %v2688_v11  ;;  %v2883_v21 = vpack.c.bf16 %v2882_v20, %v2882_v20  ;;  %v4863_v9 = vld [vmem:[%s5588_s4 + $0x38] sm:$0xff]   ;;  %v4866_v11 = vld [vmem:[%s5588_s4 + $0x20] sm:$0xff]  }
 0x676   : > { %4485 = vmatmul.mubr.bf16.vlgmr.msra.gmra.mxu1 %v2669_v12  ;;  %4489 = vmatpush3.bf16.msra.mxu0 %v4831_v10  ;;  %v4865_v10 = vld [vmem:[%s5588_s4 + $0x28] sm:$0xff]   ;;  %v4867_v12 = vld [vmem:[%s5588_s4 + $0x18] sm:$0xff]  }
 0x677   : > { %4504 = vmatprep.mubr.msk.bf16.mxu0 %vm4999_vm2, %v4997_v0  ;;  %4490 = vmatprep.subr.bf16.mxu0 %v4997_v0 }
 0x678   : > { %4524 = vmatprep.mubr.msk.bf16.mxu1 %vm4999_vm2, %v4997_v0  ;;  %4509 = vmatpush3.bf16.msra.mxu1 %v4839_v22 }
 0x679   : > { %4510 = vmatprep.subr.bf16.mxu1 %v4997_v0 }
 0x67a   : > { %4491 = vmatpush3.bf16.msra.mxu0 %v4832_v13  ;;  %v4868_v13 = vld [vmem:[%s5588_s4 + $0x10] sm:$0xff]  }
 0x67b   : > { %4492 = vmatprep.subr.bf16.mxu0 %v4997_v0 }
 0x67c   : > { %4511 = vmatpush3.bf16.msra.mxu1 %v4841_v24 }
 0x67d   : > { %4512 = vmatprep.subr.bf16.mxu1 %v4997_v0 }
 0x67e   : > { %4493 = vmatpush3.bf16.msra.mxu0 %v4833_v14  ;;  %v4869_v14 = vld [vmem:[%s5588_s4 + $0x8] sm:$0xff]  }
 0x67f   : > { %4494 = vmatprep.subr.bf16.mxu0 %v4997_v0 }
 0x680   : > { %4513 = vmatpush3.bf16.msra.mxu1 %v4843_v25  ;;  %v3791_v25 = vld [vmem:[%s5589_s5 + $0xa] ss:$0 sm:$0xff] }
 0x681   : > { %4514 = vmatprep.subr.bf16.mxu1 %v4997_v0 }
 0x682   : > { %4495 = vmatpush3.bf16.msra.mxu0 %v4834_v15  ;;  %v4870_v15 = vld [vmem:[%s5588_s4] sm:$0xff]  }
 0x683   : > { %4496 = vmatprep.subr.bf16.mxu0 %v4997_v0 }
 0x684   : > { %4515 = vmatpush3.bf16.msra.mxu1 %v4845_v27 }
 0x685   : > { %4516 = vmatprep.subr.bf16.mxu1 %v4997_v0 }
 0x686   : > { %4497 = vmatpush3.bf16.msra.mxu0 %v4835_v16 }
 0x687   : > { %4498 = vmatprep.subr.bf16.mxu0 %v4997_v0 }
 0x688   : > { %4517 = vmatpush3.bf16.msra.mxu1 %v4847_v29 }
 0x689   : > { %4518 = vmatprep.subr.bf16.mxu1 %v4997_v0 }
 0x68a   : > { %4499 = vmatpush3.bf16.msra.mxu0 %v4836_v17 }
 0x68b   : > { %4500 = vmatprep.subr.bf16.mxu0 %v4997_v0 }
 0x68c   : > { %4519 = vmatpush3.bf16.msra.mxu1 %v4849_v31  ;;  %v3006_v31 = vld [vmem:[#allocation5 + $0x8] sm:$0xf] }
 0x68d   : > { %4520 = vmatprep.subr.bf16.mxu1 %v4997_v0 }
 0x68e   : > { %4501 = vmatpush3.bf16.msra.mxu0 %v4837_v18 }
 0x68f   : > { %4502 = vmatprep.subr.bf16.mxu0 %v4997_v0 }
 0x690   : > { %4521 = vmatpush3.bf16.msra.mxu1 %v4851_v33 }
 0x691   : > { %4522 = vmatprep.subr.bf16.mxu1 %v4997_v0 }
 0x692   : > { %4503 = vmatpush3.bf16.msra.mxu0 %v4838_v19 }
 0x693   : > { %4528 = vmatprep.subr.bf16.mxu0 %v4997_v0 }
 0x694   : > { %4523 = vmatpush3.bf16.msra.mxu1 %v4853_v35 }
 0x695   : > { %4505 = vmatmul.mubr.bf16.vlgmr.msra.gmra.mxu0 %v2883_v21  ;;  %4548 = vmatprep.subr.bf16.mxu1 %v4997_v0 }
 0x696   : > { %4544 = vmatprep.mubr.msk.bf16.mxu0 %vm4999_vm2, %v4997_v0  ;;  %4529 = vmatpush3.bf16.msra.mxu0 %v4840_v23 }
 0x697   : > { %4530 = vmatprep.subr.bf16.mxu0 %v4997_v0 }
 0x69a   : > { %4531 = vmatpush3.bf16.msra.mxu0 %v4842_v45 }
 0x69b   : > { %4532 = vmatprep.subr.bf16.mxu0 %v4997_v0 }
 0x69e   : > { %4533 = vmatpush3.bf16.msra.mxu0 %v4844_v26 }
 0x69f   : > { %4534 = vmatprep.subr.bf16.mxu0 %v4997_v0 }
 0x6a2   : > { %4535 = vmatpush3.bf16.msra.mxu0 %v4846_v28 }
 0x6a3   : > { %4536 = vmatprep.subr.bf16.mxu0 %v4997_v0 }
 0x6a6   : > { %4537 = vmatpush3.bf16.msra.mxu0 %v4848_v30 }
 0x6a7   : > { %4538 = vmatprep.subr.bf16.mxu0 %v4997_v0 }
 0x6aa   : > { %4539 = vmatpush3.bf16.msra.mxu0 %v4850_v32 }
 0x6ab   : > { %4540 = vmatprep.subr.bf16.mxu0 %v4997_v0 }
 0x6ae   : > { %4541 = vmatpush3.bf16.msra.mxu0 %v4852_v34 }
 0x6af   : > { %4542 = vmatprep.subr.bf16.mxu0 %v4997_v0 }
 0x6b2   : > { %4543 = vmatpush3.bf16.msra.mxu0 %v4854_v36 }
 0x6b3   : > { %4568 = vmatprep.subr.bf16.mxu0 %v4997_v0 }
 0x735   : > { %v2788_v37 = vpop.f32.mrf.mxu0 }
 0x736   : > { %v2876_v38 = vpop.f32.mrf.mxu1 }
 0x737   : > { %v4466_v39 = vpop.f32.mrf.mxu0  ;;  %v2877_v43 = vadd.f32 %v2876_v38, %v2788_v37 }
 0x738   : > { %v4486_v40 = vpop.f32.mrf.mxu1 }
 0x739   : > { %v2791_v41 = vpop.f32.mrf.mxu0 }
 0x73a   : > { %v2879_v42 = vpop.f32.mrf.mxu1 }
 0x73b   : > { %v4467_v44 = vpop.f32.mrf.mxu0 }
 0x73c   : > { %v4487_v46 = vpop.f32.mrf.mxu1 }
 0x73d   : > { %v3370_v46 = vld [vmem:[%s5590_s6 + $0xb] sm:$0x1] }
 0x755   : > { %v2983_v47 = vpop.f32.mrf.mxu0 }
 0x756   : > { %v2989_v49 = vadd.f32 %v2983_v47, %v2877_v43 }
 0x757   : > { %v4506_v51 = vpop.f32.mrf.mxu0 }
 0x758   : > { %v2995_v52 = vmul.f32 %v3765_v48, %v2989_v49 }
 0x759   : > { %v2986_v53 = vpop.f32.mrf.mxu0 }
 0x75a   : > { %v3001_v54 = vadd.f32 %v3766_v50, %v2995_v52 }
 0x75b   : > { %v4507_v55 = vpop.f32.mrf.mxu0 }
 0x75c   : > { %v3002_v56 = vmax.f32 %v3001_v54, 0.0 }
 0x75e   : > { %3004 = vst [vmem:[#allocation6 + $0x8] sm:$0xf] %v3002_v56 }
 0x765   : > { %v3026_v57 = vld [vmem:[#allocation6 + $0x8] sm:$0xf] }
 0x766   : > { %v3007_v58 = vld [vmem:[#allocation6 + $0x7] sm:$0xf]  ;;  %v3027_v60 = vpack.c.bf16 %v3026_v57, %v3026_v57 }
 0x767   : > { %v3008_v61 = vpack.c.bf16 %v3007_v58, %v3007_v58  ;;  %v3221_v7 = vld [vmem:[#allocation6 + $0x9] sm:$0xf] }
 0x768   : > { %4525 = vmatmul.mubr.bf16.vlgmr.msra.gmra.mxu1 %v3027_v60  ;;  %v3222_v8 = vpack.c.bf16 %v3221_v7, %v3221_v7 }
 0x769   : > { %4545 = vmatmul.mubr.bf16.vlgmr.msra.gmra.mxu0 %v3008_v61  ;;  %4549 = vmatpush3.bf16.msra.mxu1 %v4855_v59 }
 0x76a   : > { %4564 = vmatprep.mubr.msk.bf16.mxu1 %vm4999_vm2, %v4997_v0  ;;  %4550 = vmatprep.subr.bf16.mxu1 %v4997_v0 }
 0x76b   : > { %4584 = vmatprep.mubr.msk.bf16.mxu0 %vm4999_vm2, %v4997_v0  ;;  %4569 = vmatpush3.bf16.msra.mxu0 %v4863_v9 }
 0x76c   : > { %4570 = vmatprep.subr.bf16.mxu0 %v4997_v0 }
 0x76d   : > { %4551 = vmatpush3.bf16.msra.mxu1 %v4856_v62 }
 0x76e   : > { %4552 = vmatprep.subr.bf16.mxu1 %v4997_v0 }
 0x76f   : > { %4571 = vmatpush3.bf16.msra.mxu0 %v4864_v5 }
 0x770   : > { %4572 = vmatprep.subr.bf16.mxu0 %v4997_v0 }
 0x771   : > { %4553 = vmatpush3.bf16.msra.mxu1 %v4857_v63 }
 0x772   : > { %4554 = vmatprep.subr.bf16.mxu1 %v4997_v0 }
 0x773   : > { %4573 = vmatpush3.bf16.msra.mxu0 %v4865_v10 }
 0x774   : > { %4574 = vmatprep.subr.bf16.mxu0 %v4997_v0 }
 0x775   : > { %4555 = vmatpush3.bf16.msra.mxu1 %v4858_v1 }
 0x776   : > { %4556 = vmatprep.subr.bf16.mxu1 %v4997_v0 }
 0x777   : > { %4575 = vmatpush3.bf16.msra.mxu0 %v4866_v11 }
 0x778   : > { %4576 = vmatprep.subr.bf16.mxu0 %v4997_v0 }
 0x779   : > { %4557 = vmatpush3.bf16.msra.mxu1 %v4859_v2 }
 0x77a   : > { %4558 = vmatprep.subr.bf16.mxu1 %v4997_v0 }
 0x77b   : > { %4577 = vmatpush3.bf16.msra.mxu0 %v4867_v12 }
 0x77c   : > { %4578 = vmatprep.subr.bf16.mxu0 %v4997_v0 }
 0x77d   : > { %4559 = vmatpush3.bf16.msra.mxu1 %v4860_v3 }
 0x77e   : > { %4560 = vmatprep.subr.bf16.mxu1 %v4997_v0 }
 0x77f   : > { %4579 = vmatpush3.bf16.msra.mxu0 %v4868_v13 }
 0x780   : > { %4580 = vmatprep.subr.bf16.mxu0 %v4997_v0 }
 0x781   : > { %4561 = vmatpush3.bf16.msra.mxu1 %v4861_v4 }
 0x782   : > { %4562 = vmatprep.subr.bf16.mxu1 %v4997_v0 }
 0x783   : > { %4581 = vmatpush3.bf16.msra.mxu0 %v4869_v14 }
 0x784   : > { %4582 = vmatprep.subr.bf16.mxu0 %v4997_v0  ;;  %v3792_v0 = vld [vmem:[%s5590_s6 + $0xa] ss:$0 sm:$0xff] }
 0x785   : > { %4563 = vmatpush3.bf16.msra.mxu1 %v4862_v6 }
 0x787   : > { %4583 = vmatpush3.bf16.msra.mxu0 %v4870_v15 }
 0x788   : > { %4565 = vmatmul.mubr.bf16.vlgmr.msra.gmra.mxu1 %v3222_v8 }
 0x828   : > { %v3127_v16 = vpop.f32.mrf.mxu1 }
 0x829   : > { %v3215_v17 = vpop.f32.mrf.mxu0 }
 0x82a   : > { %v4526_v18 = vpop.f32.mrf.mxu1  ;;  %v3216_v24 = vadd.f32 %v3215_v17, %v3127_v16 }
 0x82b   : > { %v4546_v19 = vpop.f32.mrf.mxu0 }
 0x82c   : > { %v3130_v20 = vpop.f32.mrf.mxu1 }
 0x82d   : > { %v3218_v21 = vpop.f32.mrf.mxu0 }
 0x82e   : > { %v4527_v22 = vpop.f32.mrf.mxu1 }
 0x82f   : > { %v4547_v23 = vpop.f32.mrf.mxu0 }
 0x848   : > { %v3322_v45 = vpop.f32.mrf.mxu1 }
 0x849   : > { %v3328_v26 = vadd.f32 %v3322_v45, %v3216_v24 }
 0x84a   : > { %v4566_v27 = vpop.f32.mrf.mxu1 }
 0x84b   : > { %v3334_v28 = vmul.f32 %v3791_v25, %v3328_v26 }
 0x84c   : > { %v3325_v29 = vpop.f32.mrf.mxu1 }
 0x84d   : > { %v3340_v30 = vadd.f32 %v3792_v0, %v3334_v28 }
 0x84e   : > { %v4567_v32 = vpop.f32.mrf.mxu1 }
 0x84f   : > { %v3341_v33 = vadd.f32 %v3340_v30, %v3006_v31 }
 0x851   : > { %v3342_v34 = vmax.f32 %v3341_v33, 0.0 }
 0x853   : > { %v3344_v35 = vsel %vm3343_vm3, %v3342_v34, 0.0 }
 0x854   : > { %v3345_v36 = vrot.slane %v3344_v35, 4 }
 0x856   : > { %v3346_v37 = vadd.f32 %v3345_v36, %v3344_v35 }
 0x858   : > { %v3347_v38 = vrot.slane %v3346_v37, 2 }
 0x85a   : > { %v3348_v39 = vadd.f32 %v3347_v38, %v3346_v37 }
 0x85c   : > { %v3349_v40 = vrot.slane %v3348_v39, 1 }
 0x85e   : > { %v3350_v41 = vadd.f32 %v3349_v40, %v3348_v39 }
 0x860   : > { %v3352_v42 = vmul.f32 0.25, %v3350_v41 }
 0x862   : > { %v3353_v44 = vpack.c.bf16 %v3352_v42, %v3352_v42 }
 0x864   : > { %4585 = vmatmul.mubr.bf16.vlgmr.msra.gmra.mxu0 %v3353_v44 }
 0x924   : > { %v3453_v43 = vpop.f32.mrf.mxu0 }
 0x925   : > { %v3454_v47 = vadd.f32 %v3453_v43, %v3370_v46 }
 0x926   : > { %v4586_v48 = vpop.f32.mrf.mxu0 }
 0x927   : > { %3459 = vst [vmem:[%s300_s18] sm:$0x1] %v3454_v47 }
 0x928   : > { %v3456_v49 = vpop.f32.mrf.mxu0 }
 0x929   : > { %4936 = shalt.err (!%p4933_p3)
}
 0x92a   : > { %s4937_s13 = scalar_lea.hbm %s5543_s22, 16  ;;  %s4941_s16 = scalar_lea.hbm %s5591_s7, 32 }
 0x92b   : > { %p4938_p2 = scmp.ne.s32.totalorder %s5543_s22, %s4937_s13  ;;  %p4942_p7 = scmp.lt.s32.totalorder %s5543_s22, %s5591_s7 }
 0x92c   : > { %p4943_p6 = scmp.lt.s32.totalorder %s4941_s16, %s4937_s13 }
 0x92d   : > { %p4939_p4 = pnand %p4938_p2, %p5079_p5 }
 0x92e   : > { %p4944_p9 = por %p4943_p6, %p4942_p7 }
 0x92f   : > { %p4940_p13 = pneg %p4939_p4 }
 0x931   : > { %p4945_p10 = pnand %p4944_p9, %p4940_p13 }
 0x933   : > { %4948 = shalt.err (!%p4945_p10)
}
 0x934   : > { %4596 = dma.vmem_to_hbm [thread:$0]  (%p5079_p5), %s5545_s19, 16, %s5543_s22, %s3461_s23   ;;  %v4587_v50 = vpop.f32.mrf.mxu0 }
 0x935 PF: > { %p4613_p12 = scmp.ge.s32.totalorder %s4991_s27, 2  ;;  %s3485_s20 = sand.u32 1, %s4979_s24  }
 0x936   : > { %p5601_p8 = scmp.ne.s32.totalorder %s5594_s12, 0  ;;  %s3486_s21 = scalar_lea.sflag [#allocation9], %s3485_s20 }
 0x938   : > { %p4606_p11 = pnand %p4613_p12, %p5601_p8 }
 0x93a   : > { %p4607_p0 = pneg %p4606_p11 }
 0x93c   : > { %4974 = dma.done.wait (%p4607_p0), %s3486_s21, 16  }
 0x93d   : > { %4976 = vsyncadd (%p4607_p0), %s3486_s21, 4294967280  ;;  %p19_p1 = scmp.ge.s32.totalorder %s5066_s30, 4   ;;  %s5602_s24 = smov %s4983_s25 }
 0x93e   : > { %s5603_s25 = smov %s4987_s26  ;;  %s5604_s26 = smov %s5077_s10 }
 0x93f   : > { %s5605_s27 = smov %s5066_s30  ;;  %21 = sbr.rel (!%p19_p1) target bundleno = 5 (0x5), region = 122 }
 0x944   :  { %3490 = vsyncpa [#allocation8], 1 }
 0x945   :  { %3492 = vsyncpa [#allocation8 + $0x1], 1 }
 0x946   :  { %3493 = vsyncpa [#allocation11], 1 }
 0x947   :  { %3494 = vsyncpa [#allocation9], 1 }
 0x948   :  { %3496 = vsyncpa [#allocation9 + $0x1], 1 }

</bundles_post_ra>
